<compile_context>
chip_gen: v6e
topology: v6e:2x2x1
jax: 0.10.0
libtpu: 0.0.40
codegen_flags: <defaults>
</compile_context>

<pallas_src>
import functools

import jax
import jax.numpy as jnp
from jax.experimental import pallas as pl
from jax.experimental.pallas import tpu as pltpu


# Sizes implied by the PyTorch module (fc1 = Linear(16 * 7 * 7, 120)).
_H1, _W1 = 28, 28          # conv1 spatial
_H2, _W2 = 14, 14          # conv2 spatial (after pool1)
_H3, _W3 = 7, 7            # after pool2
_C1, _C2 = 6, 16           # conv output channels
_PAD1 = _W1 + 2            # 30: padded lane-block width of conv1 input
_PAD2 = _W2 + 2            # 16: padded lane-block width of conv2 input


# ----------------------------------------------------------------------------
# Fused kernel: conv1+ReLU+pool1 -> conv2+ReLU+pool2 -> fc1..fc3 (one image)
# ----------------------------------------------------------------------------
def _lenet5_kernel(x_ref, m1_ref, b1_ref, ph1_ref, pw1_ref,
                   m2_ref, b2_ref, ph2_ref, pw2_ref,
                   ffc1_ref, bfc1_ref, wfc2_ref, bfc2_ref,
                   wfc3_ref, bfc3_ref,
                   out_ref, xp2_scr, p2_scr):
    f32 = jnp.float32

    # ---- conv1 (1 -> 6, 3x3, pad 1) + ReLU ---------------------------------
    # y1[h, c*28 + w] = relu(sum_{kh,kw} xpad[h+kh, w+kw] * W1[c,0,kh,kw] + b1[c])
    y1 = jnp.zeros((_H1, _C1 * _W1), f32)
    for kh in range(3):
        y1 += jnp.dot(x_ref[0, kh:kh + _H1, :], m1_ref[kh],
                      preferred_element_type=f32)
    y1 = jnp.maximum(y1 + b1_ref[...], 0.0)

    # ---- avgpool 2x2 + zero-pad for conv2, as two matmuls ------------------
    # xp2[1+i, c*16 + 1 + j] = 2x2 window mean; border rows/cols are zero.
    xp2_scr[...] = jnp.dot(
        ph1_ref[...],
        jnp.dot(y1, pw1_ref[...], preferred_element_type=f32),
        preferred_element_type=f32)

    # ---- conv2 (6 -> 16, 3x3, pad 1) + ReLU --------------------------------
    y2 = jnp.zeros((_H2, _C2 * _W2), f32)
    for kh in range(3):
        y2 += jnp.dot(xp2_scr[kh:kh + _H2, :], m2_ref[kh],
                      preferred_element_type=f32)
    y2 = jnp.maximum(y2 + b2_ref[...], 0.0)

    # ---- avgpool 2x2 -------------------------------------------------------
    # p2[i, c*7 + j] = pooled activation (channel-major blocks in the lane axis)
    p2_scr[...] = jnp.dot(
        ph2_ref[...],
        jnp.dot(y2, pw2_ref[...], preferred_element_type=f32),
        preferred_element_type=f32)

    # ---- fc1 + tanh (PyTorch (C,H,W) flatten order absorbed into ffc1) -----
    h1 = bfc1_ref[...]
    for h in range(_H3):
        h1 = h1 + jnp.dot(p2_scr[h:h + 1, :], ffc1_ref[h],
                          preferred_element_type=f32)
    h1 = jnp.tanh(h1)

    # ---- fc2 + tanh ---------------------------------------------------------
    h2 = jnp.tanh(jnp.dot(h1, wfc2_ref[...], preferred_element_type=f32)
                  + bfc2_ref[...])

    # ---- fc3 ----------------------------------------------------------------
    logits = (jnp.dot(h2, wfc3_ref[...], preferred_element_type=f32)
              + bfc3_ref[...])
    out_ref[0] = logits.astype(out_ref.dtype)


# ----------------------------------------------------------------------------
# Host-side constant builders (one-time weight repacking)
# ----------------------------------------------------------------------------
def _conv_band_matrices(w, w_out):
    """w: (Cout, Cin, 3, 3) -> M of shape (3, Cin*(w_out+2), Cout*w_out) with
    M[kh, ci*(w_out+2) + u, co*w_out + x] = w[co, ci, kh, u - x] for u-x in [0,2]."""
    cout, cin = w.shape[0], w.shape[1]
    block_in = w_out + 2
    u = jnp.arange(block_in)[:, None]                      # (U, 1)
    x = jnp.arange(w_out)[None, :]                         # (1, W)
    kw = u - x                                             # (U, W)
    valid = ((kw >= 0) & (kw <= 2)).astype(w.dtype)
    kwc = jnp.clip(kw, 0, 2)
    g = w[:, :, :, kwc] * valid[None, None, None, :, :]    # (Cout, Cin, 3, U, W)
    m = jnp.transpose(g, (2, 1, 3, 0, 4))                  # (3, Cin, U, Cout, W)
    return m.reshape(3, cin * block_in, cout * w_out)


def _pool_rows(h_in, pad_out):
    """Left pooling matrix: (h_in//2 + 2*pad_out, h_in), 0.5 at rows 2i, 2i+1."""
    h_out = h_in // 2
    m = jnp.zeros((h_out + 2 * pad_out, h_in), jnp.float32)
    i = jnp.arange(h_out)
    m = m.at[pad_out + i, 2 * i].set(0.5)
    m = m.at[pad_out + i, 2 * i + 1].set(0.5)
    return m


def _pool_cols(channels, w_in, pad_out):
    """Right pooling matrix: block diagonal, pools width by 2 within each
    channel block and (optionally) inserts one zero column of padding."""
    w_out = w_in // 2
    wb = w_out + 2 * pad_out
    m = jnp.zeros((channels * w_in, channels * wb), jnp.float32)
    c = jnp.repeat(jnp.arange(channels), w_out)
    j = jnp.tile(jnp.arange(w_out), channels)
    rows = c * w_in + 2 * j
    cols = c * wb + pad_out + j
    m = m.at[rows, cols].set(0.5)
    m = m.at[rows + 1, cols].set(0.5)
    return m


def _pack_params(params):
    f32 = jnp.float32
    m1 = _conv_band_matrices(params["conv1_w"].astype(f32), _W1)   # (3, 30, 168)
    b1 = jnp.repeat(params["conv1_b"].astype(f32), _W1)[None, :]   # (1, 168)
    ph1 = _pool_rows(_H1, pad_out=1)                                # (16, 28)
    pw1 = _pool_cols(_C1, _W1, pad_out=1)                           # (168, 96)

    m2 = _conv_band_matrices(params["conv2_w"].astype(f32), _W2)   # (3, 96, 224)
    b2 = jnp.repeat(params["conv2_b"].astype(f32), _W2)[None, :]   # (1, 224)
    ph2 = _pool_rows(_H2, pad_out=0)                                # (7, 14)
    pw2 = _pool_cols(_C2, _W2, pad_out=0)                           # (224, 112)

    fc1_w = params["fc1_w"].astype(f32)                             # (120, 784)
    ffc1 = (fc1_w.reshape(-1, _C2, _H3, _W3)                        # (o, c, h, w)
            .transpose(2, 1, 3, 0)                                  # (h, c, w, o)
            .reshape(_H3, _C2 * _W3, fc1_w.shape[0]))               # (7, 112, 120)
    bfc1 = params["fc1_b"].astype(f32)[None, :]
    wfc2 = params["fc2_w"].astype(f32).T
    bfc2 = params["fc2_b"].astype(f32)[None, :]
    wfc3 = params["fc3_w"].astype(f32).T
    bfc3 = params["fc3_b"].astype(f32)[None, :]
    return (m1, b1, ph1, pw1, m2, b2, ph2, pw2,
            ffc1, bfc1, wfc2, bfc2, wfc3, bfc3)


def _const_index(ndim, i):
    return (0,) * ndim


# ----------------------------------------------------------------------------
# Forward pass
# ----------------------------------------------------------------------------
def lenet5_forward(params, x_nchw):
    n = x_nchw.shape[0]
    num_classes = params["fc3_b"].shape[0]
    consts = _pack_params(params)

    x = x_nchw[:, 0].astype(jnp.float32)                    # (N, 28, 28)
    xp = jnp.pad(x, ((0, 0), (1, 1), (1, 1)))               # (N, 30, 30)

    in_specs = [pl.BlockSpec((1, _H1 + 2, _W1 + 2), lambda i: (i, 0, 0))]
    for c in consts:
        in_specs.append(
            pl.BlockSpec(c.shape, functools.partial(_const_index, c.ndim)))

    out = pl.pallas_call(
        _lenet5_kernel,
        grid=(n,),
        in_specs=in_specs,
        out_specs=pl.BlockSpec((1, 1, num_classes), lambda i: (i, 0, 0)),
        out_shape=jax.ShapeDtypeStruct((n, 1, num_classes), jnp.float32),
        scratch_shapes=[
            pltpu.VMEM((_H2 + 2, _C1 * _PAD2), jnp.float32),   # padded conv2 input
            pltpu.VMEM((_H3, _C2 * _W3), jnp.float32),         # pooled conv2 output
        ],
        compiler_params=pltpu.CompilerParams(
            dimension_semantics=("parallel",)),
    )(xp, *consts)
    return out[:, 0, :]


# ----------------------------------------------------------------------------
# Plain-JAX reference (mirrors the PyTorch module) for a numeric cross-check
# ----------------------------------------------------------------------------
def _lenet5_reference(params, x_nchw):
    x = x_nchw.astype(jnp.float32)

    def conv(a, w, b):
        y = jax.lax.conv_general_dilated(
            a, w, window_strides=(1, 1), padding=((1, 1), (1, 1)),
            dimension_numbers=("NCHW", "OIHW", "NCHW"))
        return jax.nn.relu(y + b[None, :, None, None])

    def pool(a):
        n, c, h, w = a.shape
        return a.reshape(n, c, h // 2, 2, w // 2, 2).mean(axis=(3, 5))

    y = pool(conv(x, params["conv1_w"], params["conv1_b"]))
    y = pool(conv(y, params["conv2_w"], params["conv2_b"]))
    flat = y.reshape(y.shape[0], -1)
    h = jnp.tanh(flat @ params["fc1_w"].T + params["fc1_b"])
    h = jnp.tanh(h @ params["fc2_w"].T + params["fc2_b"])
    return h @ params["fc3_w"].T + params["fc3_b"]


# ----------------------------------------------------------------------------
# Parameters (deterministic, PyTorch-default-style uniform init)
# ----------------------------------------------------------------------------
def init_params(key, output_classes=10):
    ks = jax.random.split(key, 10)

    def u(k, shape, fan_in):
        bound = 1.0 / float(fan_in) ** 0.5
        return jax.random.uniform(k, shape, jnp.float32, -bound, bound)

    return {
        "conv1_w": u(ks[0], (6, 1, 3, 3), 1 * 9),      # (Cout, Cin, KH, KW)
        "conv1_b": u(ks[1], (6,), 1 * 9),
        "conv2_w": u(ks[2], (16, 6, 3, 3), 6 * 9),
        "conv2_b": u(ks[3], (16,), 6 * 9),
        "fc1_w": u(ks[4], (120, 784), 784),            # (out, in) like nn.Linear
        "fc1_b": u(ks[5], (120,), 784),
        "fc2_w": u(ks[6], (84, 120), 120),
        "fc2_b": u(ks[7], (84,), 120),
        "fc3_w": u(ks[8], (output_classes, 84), 84),
        "fc3_b": u(ks[9], (output_classes,), 84),
    }


# ----------------------------------------------------------------------------
if __name__ == "__main__":
    key = jax.random.PRNGKey(0)
    k_params, k_x = jax.random.split(key)

    output_classes = 10
    params = init_params(k_params, output_classes)

    # fc1 = Linear(16*7*7, 120) forces a 28x28 single-channel input.
    x = jax.random.normal(k_x, (2, 1, 28, 28), dtype=jnp.float32)

    fwd = jax.jit(lenet5_forward)
    logits = fwd(params, x)
    jax.block_until_ready(logits)

    assert logits.shape == (2, output_classes), logits.shape
    assert logits.dtype == jnp.float32

    ref = _lenet5_reference(params, x)
    err = float(jnp.max(jnp.abs(logits - ref)))
    assert err < 2e-2, f"max |pallas - reference| = {err}"

    print("KERNEL_OK")
</pallas_src>

<mosaic_0001>
module attributes {stable_mosaic.version = 11 : i64} {
  func.func @_lenet5_kernel(%arg0: i32, %arg1: memref<1x30x30xf32, #tpu.memory_space<vmem>>, %arg2: memref<3x30x168xf32, #tpu.memory_space<vmem>>, %arg3: memref<1x168xf32, #tpu.memory_space<vmem>>, %arg4: memref<16x28xf32, #tpu.memory_space<vmem>>, %arg5: memref<168x96xf32, #tpu.memory_space<vmem>>, %arg6: memref<3x96x224xf32, #tpu.memory_space<vmem>>, %arg7: memref<1x224xf32, #tpu.memory_space<vmem>>, %arg8: memref<7x14xf32, #tpu.memory_space<vmem>>, %arg9: memref<224x112xf32, #tpu.memory_space<vmem>>, %arg10: memref<7x112x120xf32, #tpu.memory_space<vmem>>, %arg11: memref<1x120xf32, #tpu.memory_space<vmem>>, %arg12: memref<120x84xf32, #tpu.memory_space<vmem>>, %arg13: memref<1x84xf32, #tpu.memory_space<vmem>>, %arg14: memref<84x10xf32, #tpu.memory_space<vmem>>, %arg15: memref<1x10xf32, #tpu.memory_space<vmem>>, %arg16: memref<1x1x10xf32, #tpu.memory_space<vmem>>, %arg17: memref<16x96xf32, #tpu.memory_space<vmem>>, %arg18: memref<7x112xf32, #tpu.memory_space<vmem>>) attributes {dimension_semantics = [#tpu.dimension_semantics<parallel>], iteration_bounds = array<i64: 2>, scalar_prefetch = 0 : i64, scratch_operands = 2 : i64, tpu.core_type = #tpu.core_type<tc>, window_params = [{transform_indices = @transform_0, window_bounds = array<i64: 1, 30, 30>}, {pipeline_mode = #tpu.pipeline_mode<synchronous>, transform_indices = @transform_1, window_bounds = array<i64: 3, 30, 168>}, {pipeline_mode = #tpu.pipeline_mode<synchronous>, transform_indices = @transform_2, window_bounds = array<i64: 1, 168>}, {pipeline_mode = #tpu.pipeline_mode<synchronous>, transform_indices = @transform_3, window_bounds = array<i64: 16, 28>}, {pipeline_mode = #tpu.pipeline_mode<synchronous>, transform_indices = @transform_4, window_bounds = array<i64: 168, 96>}, {pipeline_mode = #tpu.pipeline_mode<synchronous>, transform_indices = @transform_5, window_bounds = array<i64: 3, 96, 224>}, {pipeline_mode = #tpu.pipeline_mode<synchronous>, transform_indices = @transform_6, window_bounds = array<i64: 1, 224>}, {pipeline_mode = #tpu.pipeline_mode<synchronous>, transform_indices = @transform_7, window_bounds = array<i64: 7, 14>}, {pipeline_mode = #tpu.pipeline_mode<synchronous>, transform_indices = @transform_8, window_bounds = array<i64: 224, 112>}, {pipeline_mode = #tpu.pipeline_mode<synchronous>, transform_indices = @transform_9, window_bounds = array<i64: 7, 112, 120>}, {pipeline_mode = #tpu.pipeline_mode<synchronous>, transform_indices = @transform_10, window_bounds = array<i64: 1, 120>}, {pipeline_mode = #tpu.pipeline_mode<synchronous>, transform_indices = @transform_11, window_bounds = array<i64: 120, 84>}, {pipeline_mode = #tpu.pipeline_mode<synchronous>, transform_indices = @transform_12, window_bounds = array<i64: 1, 84>}, {pipeline_mode = #tpu.pipeline_mode<synchronous>, transform_indices = @transform_13, window_bounds = array<i64: 84, 10>}, {pipeline_mode = #tpu.pipeline_mode<synchronous>, transform_indices = @transform_14, window_bounds = array<i64: 1, 10>}, {transform_indices = @transform_15, window_bounds = array<i64: 1, 1, 10>}]} {
    %cst = arith.constant 0.000000e+00 : f32
    %0 = vector.broadcast %cst : f32 to vector<28x168xf32>
    %c0 = arith.constant 0 : index
    %c0_0 = arith.constant 0 : index
    %c0_1 = arith.constant 0 : index
    %1 = vector.load %arg1[%c0, %c0_0, %c0_1] : memref<1x30x30xf32, #tpu.memory_space<vmem>>, vector<1x28x30xf32>
    %2 = vector.shape_cast %1 : vector<1x28x30xf32> to vector<28x30xf32>
    %c0_2 = arith.constant 0 : index
    %c0_3 = arith.constant 0 : index
    %c0_4 = arith.constant 0 : index
    %3 = vector.load %arg2[%c0_2, %c0_3, %c0_4] : memref<3x30x168xf32, #tpu.memory_space<vmem>>, vector<1x30x168xf32>
    %4 = vector.shape_cast %3 : vector<1x30x168xf32> to vector<30x168xf32>
    %cst_5 = arith.constant dense<0.000000e+00> : vector<28x168xf32>
    %5 = tpu.matmul %2, %4, %cst_5 {dimension_numbers = #tpu.dot_dimension_numbers<[1], [0], [0], [1], [0, 0, 1, 1], [], []>} : vector<28x30xf32>, vector<30x168xf32>, vector<28x168xf32> -> vector<28x168xf32>
    %6 = arith.addf %0, %5 : vector<28x168xf32>
    %c0_6 = arith.constant 0 : index
    %c1 = arith.constant 1 : index
    %c0_7 = arith.constant 0 : index
    %7 = vector.load %arg1[%c0_6, %c1, %c0_7] : memref<1x30x30xf32, #tpu.memory_space<vmem>>, vector<1x28x30xf32>
    %8 = vector.shape_cast %7 : vector<1x28x30xf32> to vector<28x30xf32>
    %c1_8 = arith.constant 1 : index
    %c0_9 = arith.constant 0 : index
    %c0_10 = arith.constant 0 : index
    %9 = vector.load %arg2[%c1_8, %c0_9, %c0_10] : memref<3x30x168xf32, #tpu.memory_space<vmem>>, vector<1x30x168xf32>
    %10 = vector.shape_cast %9 : vector<1x30x168xf32> to vector<30x168xf32>
    %cst_11 = arith.constant dense<0.000000e+00> : vector<28x168xf32>
    %11 = tpu.matmul %8, %10, %cst_11 {dimension_numbers = #tpu.dot_dimension_numbers<[1], [0], [0], [1], [0, 0, 1, 1], [], []>} : vector<28x30xf32>, vector<30x168xf32>, vector<28x168xf32> -> vector<28x168xf32>
    %12 = arith.addf %6, %11 : vector<28x168xf32>
    %c0_12 = arith.constant 0 : index
    %c2 = arith.constant 2 : index
    %c0_13 = arith.constant 0 : index
    %13 = vector.load %arg1[%c0_12, %c2, %c0_13] : memref<1x30x30xf32, #tpu.memory_space<vmem>>, vector<1x28x30xf32>
    %14 = vector.shape_cast %13 : vector<1x28x30xf32> to vector<28x30xf32>
    %c2_14 = arith.constant 2 : index
    %c0_15 = arith.constant 0 : index
    %c0_16 = arith.constant 0 : index
    %15 = vector.load %arg2[%c2_14, %c0_15, %c0_16] : memref<3x30x168xf32, #tpu.memory_space<vmem>>, vector<1x30x168xf32>
    %16 = vector.shape_cast %15 : vector<1x30x168xf32> to vector<30x168xf32>
    %cst_17 = arith.constant dense<0.000000e+00> : vector<28x168xf32>
    %17 = tpu.matmul %14, %16, %cst_17 {dimension_numbers = #tpu.dot_dimension_numbers<[1], [0], [0], [1], [0, 0, 1, 1], [], []>} : vector<28x30xf32>, vector<30x168xf32>, vector<28x168xf32> -> vector<28x168xf32>
    %18 = arith.addf %12, %17 : vector<28x168xf32>
    %c0_18 = arith.constant 0 : index
    %c0_19 = arith.constant 0 : index
    %19 = vector.load %arg3[%c0_18, %c0_19] : memref<1x168xf32, #tpu.memory_space<vmem>>, vector<1x168xf32>
    %20 = vector.broadcast %19 : vector<1x168xf32> to vector<28x168xf32>
    %21 = arith.addf %18, %20 : vector<28x168xf32>
    %cst_20 = arith.constant 0.000000e+00 : f32
    %22 = vector.broadcast %cst_20 : f32 to vector<28x168xf32>
    %23 = arith.maximumf %21, %22 : vector<28x168xf32>
    %c0_21 = arith.constant 0 : index
    %c0_22 = arith.constant 0 : index
    %24 = vector.load %arg4[%c0_21, %c0_22] : memref<16x28xf32, #tpu.memory_space<vmem>>, vector<16x28xf32>
    %c0_23 = arith.constant 0 : index
    %c0_24 = arith.constant 0 : index
    %25 = vector.load %arg5[%c0_23, %c0_24] : memref<168x96xf32, #tpu.memory_space<vmem>>, vector<168x96xf32>
    %cst_25 = arith.constant dense<0.000000e+00> : vector<28x96xf32>
    %26 = tpu.matmul %23, %25, %cst_25 {dimension_numbers = #tpu.dot_dimension_numbers<[1], [0], [0], [1], [0, 0, 1, 1], [], []>} : vector<28x168xf32>, vector<168x96xf32>, vector<28x96xf32> -> vector<28x96xf32>
    %cst_26 = arith.constant dense<0.000000e+00> : vector<16x96xf32>
    %27 = tpu.matmul %24, %26, %cst_26 {dimension_numbers = #tpu.dot_dimension_numbers<[1], [0], [0], [1], [0, 0, 1, 1], [], []>} : vector<16x28xf32>, vector<28x96xf32>, vector<16x96xf32> -> vector<16x96xf32>
    %c0_27 = arith.constant 0 : index
    %c0_28 = arith.constant 0 : index
    %28 = vector.load %arg17[%c0_27, %c0_28] : memref<16x96xf32, #tpu.memory_space<vmem>>, vector<16x96xf32>
    tpu.vector_store %arg17[%c0_27, %c0_28], %27 {strides = array<i32>} : memref<16x96xf32, #tpu.memory_space<vmem>>, vector<16x96xf32>,
    %cst_29 = arith.constant 0.000000e+00 : f32
    %29 = vector.broadcast %cst_29 : f32 to vector<14x224xf32>
    %c0_30 = arith.constant 0 : index
    %c0_31 = arith.constant 0 : index
    %30 = vector.load %arg17[%c0_30, %c0_31] : memref<16x96xf32, #tpu.memory_space<vmem>>, vector<14x96xf32>
    %c0_32 = arith.constant 0 : index
    %c0_33 = arith.constant 0 : index
    %c0_34 = arith.constant 0 : index
    %31 = vector.load %arg6[%c0_32, %c0_33, %c0_34] : memref<3x96x224xf32, #tpu.memory_space<vmem>>, vector<1x96x224xf32>
    %32 = vector.shape_cast %31 : vector<1x96x224xf32> to vector<96x224xf32>
    %cst_35 = arith.constant dense<0.000000e+00> : vector<14x224xf32>
    %33 = tpu.matmul %30, %32, %cst_35 {dimension_numbers = #tpu.dot_dimension_numbers<[1], [0], [0], [1], [0, 0, 1, 1], [], []>} : vector<14x96xf32>, vector<96x224xf32>, vector<14x224xf32> -> vector<14x224xf32>
    %34 = arith.addf %29, %33 : vector<14x224xf32>
    %c1_36 = arith.constant 1 : index
    %c0_37 = arith.constant 0 : index
    %35 = vector.load %arg17[%c1_36, %c0_37] : memref<16x96xf32, #tpu.memory_space<vmem>>, vector<14x96xf32>
    %c1_38 = arith.constant 1 : index
    %c0_39 = arith.constant 0 : index
    %c0_40 = arith.constant 0 : index
    %36 = vector.load %arg6[%c1_38, %c0_39, %c0_40] : memref<3x96x224xf32, #tpu.memory_space<vmem>>, vector<1x96x224xf32>
    %37 = vector.shape_cast %36 : vector<1x96x224xf32> to vector<96x224xf32>
    %cst_41 = arith.constant dense<0.000000e+00> : vector<14x224xf32>
    %38 = tpu.matmul %35, %37, %cst_41 {dimension_numbers = #tpu.dot_dimension_numbers<[1], [0], [0], [1], [0, 0, 1, 1], [], []>} : vector<14x96xf32>, vector<96x224xf32>, vector<14x224xf32> -> vector<14x224xf32>
    %39 = arith.addf %34, %38 : vector<14x224xf32>
    %c2_42 = arith.constant 2 : index
    %c0_43 = arith.constant 0 : index
    %40 = vector.load %arg17[%c2_42, %c0_43] : memref<16x96xf32, #tpu.memory_space<vmem>>, vector<14x96xf32>
    %c2_44 = arith.constant 2 : index
    %c0_45 = arith.constant 0 : index
    %c0_46 = arith.constant 0 : index
    %41 = vector.load %arg6[%c2_44, %c0_45, %c0_46] : memref<3x96x224xf32, #tpu.memory_space<vmem>>, vector<1x96x224xf32>
    %42 = vector.shape_cast %41 : vector<1x96x224xf32> to vector<96x224xf32>
    %cst_47 = arith.constant dense<0.000000e+00> : vector<14x224xf32>
    %43 = tpu.matmul %40, %42, %cst_47 {dimension_numbers = #tpu.dot_dimension_numbers<[1], [0], [0], [1], [0, 0, 1, 1], [], []>} : vector<14x96xf32>, vector<96x224xf32>, vector<14x224xf32> -> vector<14x224xf32>
    %44 = arith.addf %39, %43 : vector<14x224xf32>
    %c0_48 = arith.constant 0 : index
    %c0_49 = arith.constant 0 : index
    %45 = vector.load %arg7[%c0_48, %c0_49] : memref<1x224xf32, #tpu.memory_space<vmem>>, vector<1x224xf32>
    %46 = vector.broadcast %45 : vector<1x224xf32> to vector<14x224xf32>
    %47 = arith.addf %44, %46 : vector<14x224xf32>
    %cst_50 = arith.constant 0.000000e+00 : f32
    %48 = vector.broadcast %cst_50 : f32 to vector<14x224xf32>
    %49 = arith.maximumf %47, %48 : vector<14x224xf32>
    %c0_51 = arith.constant 0 : index
    %c0_52 = arith.constant 0 : index
    %50 = vector.load %arg8[%c0_51, %c0_52] : memref<7x14xf32, #tpu.memory_space<vmem>>, vector<7x14xf32>
    %c0_53 = arith.constant 0 : index
    %c0_54 = arith.constant 0 : index
    %51 = vector.load %arg9[%c0_53, %c0_54] : memref<224x112xf32, #tpu.memory_space<vmem>>, vector<224x112xf32>
    %cst_55 = arith.constant dense<0.000000e+00> : vector<14x112xf32>
    %52 = tpu.matmul %49, %51, %cst_55 {dimension_numbers = #tpu.dot_dimension_numbers<[1], [0], [0], [1], [0, 0, 1, 1], [], []>} : vector<14x224xf32>, vector<224x112xf32>, vector<14x112xf32> -> vector<14x112xf32>
    %cst_56 = arith.constant dense<0.000000e+00> : vector<7x112xf32>
    %53 = tpu.matmul %50, %52, %cst_56 {dimension_numbers = #tpu.dot_dimension_numbers<[1], [0], [0], [1], [0, 0, 1, 1], [], []>} : vector<7x14xf32>, vector<14x112xf32>, vector<7x112xf32> -> vector<7x112xf32>
    %c0_57 = arith.constant 0 : index
    %c0_58 = arith.constant 0 : index
    %54 = vector.load %arg18[%c0_57, %c0_58] : memref<7x112xf32, #tpu.memory_space<vmem>>, vector<7x112xf32>
    tpu.vector_store %arg18[%c0_57, %c0_58], %53 {strides = array<i32>} : memref<7x112xf32, #tpu.memory_space<vmem>>, vector<7x112xf32>,
    %c0_59 = arith.constant 0 : index
    %c0_60 = arith.constant 0 : index
    %55 = vector.load %arg11[%c0_59, %c0_60] : memref<1x120xf32, #tpu.memory_space<vmem>>, vector<1x120xf32>
    %c0_61 = arith.constant 0 : index
    %c0_62 = arith.constant 0 : index
    %56 = vector.load %arg18[%c0_61, %c0_62] : memref<7x112xf32, #tpu.memory_space<vmem>>, vector<1x112xf32>
    %c0_63 = arith.constant 0 : index
    %c0_64 = arith.constant 0 : index
    %c0_65 = arith.constant 0 : index
    %57 = vector.load %arg10[%c0_63, %c0_64, %c0_65] : memref<7x112x120xf32, #tpu.memory_space<vmem>>, vector<1x112x120xf32>
    %58 = vector.shape_cast %57 : vector<1x112x120xf32> to vector<112x120xf32>
    %cst_66 = arith.constant dense<0.000000e+00> : vector<1x120xf32>
    %59 = tpu.matmul %56, %58, %cst_66 {dimension_numbers = #tpu.dot_dimension_numbers<[1], [0], [0], [1], [0, 0, 1, 1], [], []>} : vector<1x112xf32>, vector<112x120xf32>, vector<1x120xf32> -> vector<1x120xf32>
    %60 = arith.addf %55, %59 : vector<1x120xf32>
    %c1_67 = arith.constant 1 : index
    %c0_68 = arith.constant 0 : index
    %61 = vector.load %arg18[%c1_67, %c0_68] : memref<7x112xf32, #tpu.memory_space<vmem>>, vector<1x112xf32>
    %c1_69 = arith.constant 1 : index
    %c0_70 = arith.constant 0 : index
    %c0_71 = arith.constant 0 : index
    %62 = vector.load %arg10[%c1_69, %c0_70, %c0_71] : memref<7x112x120xf32, #tpu.memory_space<vmem>>, vector<1x112x120xf32>
    %63 = vector.shape_cast %62 : vector<1x112x120xf32> to vector<112x120xf32>
    %cst_72 = arith.constant dense<0.000000e+00> : vector<1x120xf32>
    %64 = tpu.matmul %61, %63, %cst_72 {dimension_numbers = #tpu.dot_dimension_numbers<[1], [0], [0], [1], [0, 0, 1, 1], [], []>} : vector<1x112xf32>, vector<112x120xf32>, vector<1x120xf32> -> vector<1x120xf32>
    %65 = arith.addf %60, %64 : vector<1x120xf32>
    %c2_73 = arith.constant 2 : index
    %c0_74 = arith.constant 0 : index
    %66 = vector.load %arg18[%c2_73, %c0_74] : memref<7x112xf32, #tpu.memory_space<vmem>>, vector<1x112xf32>
    %c2_75 = arith.constant 2 : index
    %c0_76 = arith.constant 0 : index
    %c0_77 = arith.constant 0 : index
    %67 = vector.load %arg10[%c2_75, %c0_76, %c0_77] : memref<7x112x120xf32, #tpu.memory_space<vmem>>, vector<1x112x120xf32>
    %68 = vector.shape_cast %67 : vector<1x112x120xf32> to vector<112x120xf32>
    %cst_78 = arith.constant dense<0.000000e+00> : vector<1x120xf32>
    %69 = tpu.matmul %66, %68, %cst_78 {dimension_numbers = #tpu.dot_dimension_numbers<[1], [0], [0], [1], [0, 0, 1, 1], [], []>} : vector<1x112xf32>, vector<112x120xf32>, vector<1x120xf32> -> vector<1x120xf32>
    %70 = arith.addf %65, %69 : vector<1x120xf32>
    %c3 = arith.constant 3 : index
    %c0_79 = arith.constant 0 : index
    %71 = vector.load %arg18[%c3, %c0_79] : memref<7x112xf32, #tpu.memory_space<vmem>>, vector<1x112xf32>
    %c3_80 = arith.constant 3 : index
    %c0_81 = arith.constant 0 : index
    %c0_82 = arith.constant 0 : index
    %72 = vector.load %arg10[%c3_80, %c0_81, %c0_82] : memref<7x112x120xf32, #tpu.memory_space<vmem>>, vector<1x112x120xf32>
    %73 = vector.shape_cast %72 : vector<1x112x120xf32> to vector<112x120xf32>
    %cst_83 = arith.constant dense<0.000000e+00> : vector<1x120xf32>
    %74 = tpu.matmul %71, %73, %cst_83 {dimension_numbers = #tpu.dot_dimension_numbers<[1], [0], [0], [1], [0, 0, 1, 1], [], []>} : vector<1x112xf32>, vector<112x120xf32>, vector<1x120xf32> -> vector<1x120xf32>
    %75 = arith.addf %70, %74 : vector<1x120xf32>
    %c4 = arith.constant 4 : index
    %c0_84 = arith.constant 0 : index
    %76 = vector.load %arg18[%c4, %c0_84] : memref<7x112xf32, #tpu.memory_space<vmem>>, vector<1x112xf32>
    %c4_85 = arith.constant 4 : index
    %c0_86 = arith.constant 0 : index
    %c0_87 = arith.constant 0 : index
    %77 = vector.load %arg10[%c4_85, %c0_86, %c0_87] : memref<7x112x120xf32, #tpu.memory_space<vmem>>, vector<1x112x120xf32>
    %78 = vector.shape_cast %77 : vector<1x112x120xf32> to vector<112x120xf32>
    %cst_88 = arith.constant dense<0.000000e+00> : vector<1x120xf32>
    %79 = tpu.matmul %76, %78, %cst_88 {dimension_numbers = #tpu.dot_dimension_numbers<[1], [0], [0], [1], [0, 0, 1, 1], [], []>} : vector<1x112xf32>, vector<112x120xf32>, vector<1x120xf32> -> vector<1x120xf32>
    %80 = arith.addf %75, %79 : vector<1x120xf32>
    %c5 = arith.constant 5 : index
    %c0_89 = arith.constant 0 : index
    %81 = vector.load %arg18[%c5, %c0_89] : memref<7x112xf32, #tpu.memory_space<vmem>>, vector<1x112xf32>
    %c5_90 = arith.constant 5 : index
    %c0_91 = arith.constant 0 : index
    %c0_92 = arith.constant 0 : index
    %82 = vector.load %arg10[%c5_90, %c0_91, %c0_92] : memref<7x112x120xf32, #tpu.memory_space<vmem>>, vector<1x112x120xf32>
    %83 = vector.shape_cast %82 : vector<1x112x120xf32> to vector<112x120xf32>
    %cst_93 = arith.constant dense<0.000000e+00> : vector<1x120xf32>
    %84 = tpu.matmul %81, %83, %cst_93 {dimension_numbers = #tpu.dot_dimension_numbers<[1], [0], [0], [1], [0, 0, 1, 1], [], []>} : vector<1x112xf32>, vector<112x120xf32>, vector<1x120xf32> -> vector<1x120xf32>
    %85 = arith.addf %80, %84 : vector<1x120xf32>
    %c6 = arith.constant 6 : index
    %c0_94 = arith.constant 0 : index
    %86 = vector.load %arg18[%c6, %c0_94] : memref<7x112xf32, #tpu.memory_space<vmem>>, vector<1x112xf32>
    %c6_95 = arith.constant 6 : index
    %c0_96 = arith.constant 0 : index
    %c0_97 = arith.constant 0 : index
    %87 = vector.load %arg10[%c6_95, %c0_96, %c0_97] : memref<7x112x120xf32, #tpu.memory_space<vmem>>, vector<1x112x120xf32>
    %88 = vector.shape_cast %87 : vector<1x112x120xf32> to vector<112x120xf32>
    %cst_98 = arith.constant dense<0.000000e+00> : vector<1x120xf32>
    %89 = tpu.matmul %86, %88, %cst_98 {dimension_numbers = #tpu.dot_dimension_numbers<[1], [0], [0], [1], [0, 0, 1, 1], [], []>} : vector<1x112xf32>, vector<112x120xf32>, vector<1x120xf32> -> vector<1x120xf32>
    %90 = arith.addf %85, %89 : vector<1x120xf32>
    %91 = math.tanh %90 : vector<1x120xf32>
    %c0_99 = arith.constant 0 : index
    %c0_100 = arith.constant 0 : index
    %92 = vector.load %arg12[%c0_99, %c0_100] : memref<120x84xf32, #tpu.memory_space<vmem>>, vector<120x84xf32>
    %cst_101 = arith.constant dense<0.000000e+00> : vector<1x84xf32>
    %93 = tpu.matmul %91, %92, %cst_101 {dimension_numbers = #tpu.dot_dimension_numbers<[1], [0], [0], [1], [0, 0, 1, 1], [], []>} : vector<1x120xf32>, vector<120x84xf32>, vector<1x84xf32> -> vector<1x84xf32>
    %c0_102 = arith.constant 0 : index
    %c0_103 = arith.constant 0 : index
    %94 = vector.load %arg13[%c0_102, %c0_103] : memref<1x84xf32, #tpu.memory_space<vmem>>, vector<1x84xf32>
    %95 = arith.addf %93, %94 : vector<1x84xf32>
    %96 = math.tanh %95 : vector<1x84xf32>
    %c0_104 = arith.constant 0 : index
    %c0_105 = arith.constant 0 : index
    %97 = vector.load %arg14[%c0_104, %c0_105] : memref<84x10xf32, #tpu.memory_space<vmem>>, vector<84x10xf32>
    %cst_106 = arith.constant dense<0.000000e+00> : vector<1x10xf32>
    %98 = tpu.matmul %96, %97, %cst_106 {dimension_numbers = #tpu.dot_dimension_numbers<[1], [0], [0], [1], [0, 0, 1, 1], [], []>} : vector<1x84xf32>, vector<84x10xf32>, vector<1x10xf32> -> vector<1x10xf32>
    %c0_107 = arith.constant 0 : index
    %c0_108 = arith.constant 0 : index
    %99 = vector.load %arg15[%c0_107, %c0_108] : memref<1x10xf32, #tpu.memory_space<vmem>>, vector<1x10xf32>
    %100 = arith.addf %98, %99 : vector<1x10xf32>
    %c0_109 = arith.constant 0 : index
    %c0_110 = arith.constant 0 : index
    %c0_111 = arith.constant 0 : index
    %101 = vector.load %arg16[%c0_109, %c0_110, %c0_111] : memref<1x1x10xf32, #tpu.memory_space<vmem>>, vector<1x1x10xf32>
    %102 = vector.shape_cast %101 : vector<1x1x10xf32> to vector<1x10xf32>
    %103 = vector.shape_cast %100 : vector<1x10xf32> to vector<1x1x10xf32>
    tpu.vector_store %arg16[%c0_109, %c0_110, %c0_111], %103 {strides = array<i32>} : memref<1x1x10xf32, #tpu.memory_space<vmem>>, vector<1x1x10xf32>,
    return
  }
  func.func @transform_0(%arg0: i32) -> (i32, i32, i32) {
    %c0_i32 = arith.constant 0 : i32
    %c0_i32_0 = arith.constant 0 : i32
    %c0_i32_1 = arith.constant 0 : i32
    return %arg0, %c0_i32, %c0_i32_0 : i32, i32, i32
  }
  func.func @transform_1(%arg0: i32) -> (i32, i32, i32) {
    %c0_i32 = arith.constant 0 : i32
    %c0_i32_0 = arith.constant 0 : i32
    %c0_i32_1 = arith.constant 0 : i32
    %c0_i32_2 = arith.constant 0 : i32
    return %c0_i32, %c0_i32_0, %c0_i32_1 : i32, i32, i32
  }
  func.func @transform_2(%arg0: i32) -> (i32, i32) {
    %c0_i32 = arith.constant 0 : i32
    %c0_i32_0 = arith.constant 0 : i32
    %c0_i32_1 = arith.constant 0 : i32
    return %c0_i32, %c0_i32_0 : i32, i32
  }
  func.func @transform_3(%arg0: i32) -> (i32, i32) {
    %c0_i32 = arith.constant 0 : i32
    %c0_i32_0 = arith.constant 0 : i32
    %c0_i32_1 = arith.constant 0 : i32
    return %c0_i32, %c0_i32_0 : i32, i32
  }
  func.func @transform_4(%arg0: i32) -> (i32, i32) {
    %c0_i32 = arith.constant 0 : i32
    %c0_i32_0 = arith.constant 0 : i32
    %c0_i32_1 = arith.constant 0 : i32
    return %c0_i32, %c0_i32_0 : i32, i32
  }
  func.func @transform_5(%arg0: i32) -> (i32, i32, i32) {
    %c0_i32 = arith.constant 0 : i32
    %c0_i32_0 = arith.constant 0 : i32
    %c0_i32_1 = arith.constant 0 : i32
    %c0_i32_2 = arith.constant 0 : i32
    return %c0_i32, %c0_i32_0, %c0_i32_1 : i32, i32, i32
  }
  func.func @transform_6(%arg0: i32) -> (i32, i32) {
    %c0_i32 = arith.constant 0 : i32
    %c0_i32_0 = arith.constant 0 : i32
    %c0_i32_1 = arith.constant 0 : i32
    return %c0_i32, %c0_i32_0 : i32, i32
  }
  func.func @transform_7(%arg0: i32) -> (i32, i32) {
    %c0_i32 = arith.constant 0 : i32
    %c0_i32_0 = arith.constant 0 : i32
    %c0_i32_1 = arith.constant 0 : i32
    return %c0_i32, %c0_i32_0 : i32, i32
  }
  func.func @transform_8(%arg0: i32) -> (i32, i32) {
    %c0_i32 = arith.constant 0 : i32
    %c0_i32_0 = arith.constant 0 : i32
    %c0_i32_1 = arith.constant 0 : i32
    return %c0_i32, %c0_i32_0 : i32, i32
  }
  func.func @transform_9(%arg0: i32) -> (i32, i32, i32) {
    %c0_i32 = arith.constant 0 : i32
    %c0_i32_0 = arith.constant 0 : i32
    %c0_i32_1 = arith.constant 0 : i32
    %c0_i32_2 = arith.constant 0 : i32
    return %c0_i32, %c0_i32_0, %c0_i32_1 : i32, i32, i32
  }
  func.func @transform_10(%arg0: i32) -> (i32, i32) {
    %c0_i32 = arith.constant 0 : i32
    %c0_i32_0 = arith.constant 0 : i32
    %c0_i32_1 = arith.constant 0 : i32
    return %c0_i32, %c0_i32_0 : i32, i32
  }
  func.func @transform_11(%arg0: i32) -> (i32, i32) {
    %c0_i32 = arith.constant 0 : i32
    %c0_i32_0 = arith.constant 0 : i32
    %c0_i32_1 = arith.constant 0 : i32
    return %c0_i32, %c0_i32_0 : i32, i32
  }
  func.func @transform_12(%arg0: i32) -> (i32, i32) {
    %c0_i32 = arith.constant 0 : i32
    %c0_i32_0 = arith.constant 0 : i32
    %c0_i32_1 = arith.constant 0 : i32
    return %c0_i32, %c0_i32_0 : i32, i32
  }
  func.func @transform_13(%arg0: i32) -> (i32, i32) {
    %c0_i32 = arith.constant 0 : i32
    %c0_i32_0 = arith.constant 0 : i32
    %c0_i32_1 = arith.constant 0 : i32
    return %c0_i32, %c0_i32_0 : i32, i32
  }
  func.func @transform_14(%arg0: i32) -> (i32, i32) {
    %c0_i32 = arith.constant 0 : i32
    %c0_i32_0 = arith.constant 0 : i32
    %c0_i32_1 = arith.constant 0 : i32
    return %c0_i32, %c0_i32_0 : i32, i32
  }
  func.func @transform_15(%arg0: i32) -> (i32, i32, i32) {
    %c0_i32 = arith.constant 0 : i32
    %c0_i32_0 = arith.constant 0 : i32
    %c0_i32_1 = arith.constant 0 : i32
    return %arg0, %c0_i32, %c0_i32_0 : i32, i32, i32
  }
}

</mosaic_0001>

<bundles_post_ra>
// kernel: lenet5_forward.1
= control target key start
LH: loop header
LB: loop body
LE: loop exit
PB: predicated region body
PF: predicated region fallthrough
CT: control target
= control target key end

     0   :  { %s4559_s0 = inlined_call_operand.vmem [shape: f32[2,30,30], index: 0, kind: input, shape index: {}]   ;;  %s4560_s1 = inlined_call_operand.vmem [shape: f32[3,30,168], index: 1, kind: input, shape index: {}]   ;;  %s4561_s2 = inlined_call_operand.vmem [shape: f32[1,168], index: 2, kind: input, shape index: {}]   ;;  %s4562_s3 = inlined_call_operand.vmem [shape: f32[16,28], index: 3, kind: input, shape index: {}]   ;;  %s4563_s4 = inlined_call_operand.vmem [shape: f32[168,96], index: 4, kind: input, shape index: {}]   ;;  %s4564_s5 = inlined_call_operand.vmem [shape: f32[3,96,224], index: 5, kind: input, shape index: {}]   ;;  %s4565_s6 = inlined_call_operand.vmem [shape: f32[1,224], index: 6, kind: input, shape index: {}]   ;;  %s4566_s7 = inlined_call_operand.vmem [shape: f32[7,14], index: 7, kind: input, shape index: {}]   ;;  %s4567_s8 = inlined_call_operand.vmem [shape: f32[224,112], index: 8, kind: input, shape index: {}]   ;;  %s4568_s9 = inlined_call_operand.vmem [shape: f32[7,112,120], index: 9, kind: input, shape index: {}]   ;;  %s4569_s10 = inlined_call_operand.vmem [shape: f32[1,120], index: 10, kind: input, shape index: {}]   ;;  %s4570_s11 = inlined_call_operand.vmem [shape: f32[120,84], index: 11, kind: input, shape index: {}]   ;;  %s4571_s12 = inlined_call_operand.vmem [shape: f32[1,84], index: 12, kind: input, shape index: {}]   ;;  %s4572_s13 = inlined_call_operand.vmem [shape: f32[84,10], index: 13, kind: input, shape index: {}]   ;;  %s4573_s14 = inlined_call_operand.vmem [shape: f32[1,10], index: 14, kind: input, shape index: {}]   ;;  %s4574_s15 = inlined_call_operand.hbm [shape: f32[2,1,10], index: 15, kind: output, shape index: {}]  }
   0x1   :  { %4579 = sst [smem:[#allocation11_spill]] %s4559_s0 }
   0x2   :  { %20 = vsyncpa [#allocation5], 0 }
   0x3   :  { %22 = vsyncpa [#allocation5 + $0x1], 0  ;;  %s3351_s18 = smov 0   ;;  %s3353_s19 = smov 0  }
   0x4   :  { %s3355_s20 = smov 0   ;;  %s3357_s21 = smov 0  }
   0x5 LB: > { %4580 = sst [smem:[#allocation7_spill]] %s3262_s20  ;;  %s3372_s22 = sadd.s32 4294967295, %s3266_s21   ;;  %s3266_s21 = sphi %s3357_s21, %s4588_s21   ;;  %s3262_s20 = sphi %s3355_s20, %s4590_s20   ;;  %s3258_s19 = sphi %s3353_s19, %s4592_s19   ;;  %s3254_s18 = sphi %s3351_s18, %s4591_s18  }
   0x6   : > { %s2523_s23 = sadd.s32 4294967294, %s3266_s21   ;;  %s3376_s24 = sadd.s32 1, %s3266_s21  }
   0x7   : > { %4581 = sst [smem:[#allocation8_spill]] %s3376_s24  ;;  %s355_s25 = sadd.s32 1, %s3262_s20 }
   0x8   : > { %s352_s26 = ssub.s32 %s3266_s21, %s3376_s24  ;;  %p365_p0 = scmp.ne.s32.totalorder %s3262_s20, %s3258_s19 }
   0x9   : > { %p353_p1 = scmp.eq.s32.totalorder %s352_s26, 0  ;;  %p366_p2 = scmp.eq.s32.totalorder %s3372_s22, 1 }
   0xa   : > { %p371_p3 = scmp.ne.s32.totalorder %s3258_s19, %s3254_s18  ;;  %p372_p4 = scmp.eq.s32.totalorder %s2523_s23, 1 }
   0xb   : > { %s3387_s27 = scalar_select %p353_p1, %s3262_s20, %s355_s25  }
   0xc   : > { %p3389_p5 = por %p366_p2, %p365_p0  ;;  %p3393_p6 = por %p372_p4, %p371_p3 }
   0xd   : > { %4582 = sst [smem:[#allocation9_spill]] %s3387_s27  ;;  %p2526_p7 = scmp.ge.s32.totalorder %s3266_s21, 1 }
   0xe   : > { %s4584_s29 = scalar_select %p3393_p6, 1, 0 }
   0xf   : > { %p440_p8 = scmp.lt.s32.totalorder %s3266_s21, 3 }
  0x10   : > { %4585 = sst [smem:[#allocation10_spill]] %s4584_s29 }
  0x11   : > { %p441_p9 = pnand %p2526_p7, %p440_p8 }
  0x12   : > { %p487_p10 = scmp.lt.s32.totalorder (!%p441_p9), %s3372_s22, 1  ;;  %s4586_s0 = sld [smem:[#allocation11_spill]] (!%p441_p9) }
  0x13   : > { %444 = sbr.rel (%p441_p9) target bundleno = 2011 (0x7db), region = 80  ;;  %s485_s30 = sand.u32 (!%p441_p9), 1, %s3258_s19  }
  0x14   : > { %s486_s25 = scalar_lea.vmem (!%p441_p9), [#allocation4], %s485_s30  ;;  %s2456_s29 = scalar_lea.sflag (!%p441_p9), [#allocation5], %s485_s30 }
  0x15   : > { %s2468_s20 = sshll.u32 (!%p441_p9), %s486_s25, 4  ;;  %s2469_s20 = int_to_ptr.vmem [resolvable:$true] %s2468_s20 }
  0x18   : > { %v2536_v0 = vld [vmem:[%s4560_s1 + $0x78] sm:$0x3f]  ;;  %vm530_vm0 = vcmask 1045504   ;;  %v2534_v2 = vld [vmem:[%s4560_s1 + $0x68] sm:$0xff]  ;;  %v2535_v3 = vld [vmem:[%s4560_s1 + $0x70] sm:$0x3f]  ;;  %v863_v63 = vlaneseq }
  0x19   : > { %v503_v1 = vld [vmem:[%s4560_s1 + $0x38] sm:$0x3f]  ;;  %2537 = vmatprep.subr.msk.mxu0 %vm530_vm0, %v2536_v0  ;;  %v502_v4 = vld [vmem:[%s4560_s1 + $0x30] sm:$0x3f]  ;;  %v501_v5 = vld [vmem:[%s4560_s1 + $0x28] sm:$0xff]  ;;  %s488_s24 = scalar_select %p487_p10, %s3372_s22, 1 }
  0x1a   : > { %2543 = vmatprep.subr.msk.mxu1 %vm530_vm0, %v503_v1  ;;  %2538 = vmatpush1.msk.msra.mxu0 %vm530_vm0, %v2535_v3  ;;  %v2533_v6 = vld [vmem:[%s4560_s1 + $0x60] sm:$0xff]  ;;  %v2532_v8 = vld [vmem:[%s4560_s1 + $0x58] sm:$0xff]  ;;  %v2531_v10 = vld [vmem:[%s4560_s1 + $0x50] sm:$0xff]  ;;  %vm517_vm1 = vcmask 244736   ;;  %v3268_v16 = vmov 0.0   ;;  %v3604_v3 = vshrl.u32 %v863_v63, 7 }
  0x1b   : > { %2544 = vmatpush1.msk.msra.mxu1 %vm530_vm0, %v502_v4  ;;  %v500_v7 = vld [vmem:[%s4560_s1 + $0x20] sm:$0xff]  ;;  %563 = vmatprep.subr.mxu0 %v2534_v2  ;;  %v499_v9 = vld [vmem:[%s4560_s1 + $0x18] sm:$0xff]  ;;  %v498_v11 = vld [vmem:[%s4560_s1 + $0x10] sm:$0xff]  ;;  %s2725_s23 = sshll.u32 %s488_s24, 5  ;;  %vm912_vm2 = vcmask 326656   ;;  %vm1010_vm3 = vcmask 228352  }
  0x1c   : > { %670 = vmatprep.subr.mxu1 %v501_v5  ;;  %564 = vmatpush1.msra.mxu0 %v2533_v6  ;;  %v2530_v12 = vld [vmem:[%s4560_s1 + $0x48] sm:$0xff]  ;;  %v2529_v14 = vld [vmem:[%s4560_s1 + $0x40] sm:$0xff]  ;;  %s3456_s27 = scalar_lea.vmem %s4586_s0, %s2725_s23  ;;  %v2556_v19 = vld [vmem:[%s4560_s1 + $0xb8] sm:$0x3f]  ;;  %vm1017_vm4 = vcmask 1043456   ;;  %vm1096_vm5 = vcmask 785408  }
  0x1d   : > { %671 = vmatpush1.msra.mxu1 %v500_v7  ;;  %v497_v13 = vld [vmem:[%s4560_s1 + $0x8] sm:$0xff]  ;;  %565 = vmatprep.subr.mxu0 %v2532_v8  ;;  %v496_v15 = vld [vmem:[%s4560_s1] sm:$0xff]  ;;  %v2555_v20 = vld [vmem:[%s4560_s1 + $0xb0] sm:$0x3f]  ;;  %v865_v7 = vsub.s32 0, %v3604_v3  ;;  %vm3269_vm6 = vmmov 0  }
  0x1e   : > { %672 = vmatprep.subr.mxu1 %v499_v9  ;;  %566 = vmatpush1.msra.mxu0 %v2531_v10  ;;  %v504_v17 = vld [vmem:[%s3456_s27 + $0x1] sm:$0xff]  ;;  %v505_v21 = vld [vmem:[%s3456_s27 + $0x9] sm:$0xff]  ;;  %v906_v23 = vld [vmem:[%s4563_s4 + $0x78] sm:$0xff]  ;;  %v869_v9 = vsub.s32 1, %v3604_v3  ;;  %vm1562_vm7 = vcmask 113664   ;;  %vm1639_vm8 = vcmask 915456  }
  0x1f   : > { %673 = vmatpush1.msra.mxu1 %v498_v11  ;;  %567 = vmatprep.subr.mxu0 %v2530_v12  ;;  %v492_v18 = vld [vmem:[%s3456_s27] sm:$0xff]  ;;  %v493_v22 = vld [vmem:[%s3456_s27 + $0x8] sm:$0xff]  ;;  %v905_v26 = vld [vmem:[%s4563_s4 + $0x70] sm:$0xff]  ;;  %vm1657_vm9 = vcmask 916480   ;;  %vm2289_vm10 = vcmask 982016   ;;  %vm2376_vm11 = vcmask 687104  }
  0x20   : > { %674 = vmatprep.subr.mxu1 %v497_v13  ;;  %568 = vmatpush1.msra.mxu0 %v2529_v14  ;;  %v2554_v24 = vld [vmem:[%s4560_s1 + $0xa8] sm:$0xff]  ;;  %v2553_v25 = vld [vmem:[%s4560_s1 + $0xa0] sm:$0xff]  ;;  %v506_v27 = vld [vmem:[%s3456_s27 + $0x11] sm:$0xff]  ;;  %s2722_s23 = sshll.u32 %s3372_s22, 4  ;;  %vm2453_vm12 = vcmask 73728   ;;  %s3206_s0 = scalar_lea.vmem %s2469_s20, 16 }
  0x21   : > { %601 = vmatprep.mubr.f32.mxu0 %v3268_v16  ;;  %675 = vmatpush1.msra.mxu1 %v496_v15  ;;  %v494_v28 = vld [vmem:[%s3456_s27 + $0x10] sm:$0xff]  ;;  %v2552_v29 = vld [vmem:[%s4560_s1 + $0x98] sm:$0xff]  ;;  %v904_v31 = vld [vmem:[%s4563_s4 + $0x68] sm:$0xff]  ;;  %p3207_p11 = scmp.ne.s32.totalorder %s2469_s20, %s3206_s0  ;;  %s3270_s22 = smov [#allocation4]  }
  0x22   : > { %708 = vmatprep.mubr.f32.mxu1 %v3268_v16  ;;  %2539 = vmatmul.mubr.msk.f32.vlgmr.msra.gmra.mxu0 %vm517_vm1, %v504_v17  ;;  %v2551_v30 = vld [vmem:[%s4560_s1 + $0x90] sm:$0xff]  ;;  %v507_v32 = vld [vmem:[%s3456_s27 + $0x19] sm:$0xf]  ;;  %v2550_v34 = vld [vmem:[%s4560_s1 + $0x88] sm:$0xff]  ;;  %s3210_s16 = sshll.u32 %s3270_s22, 4  ;;  %s3211_s16 = int_to_ptr.vmem [resolvable:$false] %s3210_s16 }
  0x23   : > { %2545 = vmatmul.mubr.msk.f32.vlgmr.msra.gmra.mxu1 %vm517_vm1, %v492_v18  ;;  %607 = vmatprep.mubr.f32.mxu0 %v3268_v16  ;;  %v495_v33 = vld [vmem:[%s3456_s27 + $0x18] sm:$0xf]  ;;  %v2549_v35 = vld [vmem:[%s4560_s1 + $0x80] sm:$0xff]  ;;  %v901_v39 = vld [vmem:[%s4563_s4 + $0x50] sm:$0xff]  ;;  %p3208_p12 = pnand %p3207_p11, %p3389_p5  ;;  %s3212_s17 = scalar_lea.vmem %s3211_s16, 32 }
  0x24   : > { %714 = vmatprep.mubr.f32.mxu1 %v3268_v16  ;;  %2557 = vmatprep.subr.msk.mxu0 %vm530_vm0, %v2556_v19  ;;  %v903_v36 = vld [vmem:[%s4563_s4 + $0x60] sm:$0xff]  ;;  %v902_v38 = vld [vmem:[%s4563_s4 + $0x58] sm:$0xff]  ;;  %v734_v40 = vld [vmem:[%s3456_s27 + $0xa] sm:$0xff]  ;;  %p3213_p0 = scmp.lt.s32.totalorder %s2469_s20, %s3211_s16  ;;  %p3214_p1 = scmp.lt.s32.totalorder %s3212_s17, %s3206_s0 }
  0x25   : > { %925 = vmatprep.subr.mxu1 %v3268_v16  ;;  %2558 = vmatpush1.msk.msra.mxu0 %vm530_vm0, %v2555_v20  ;;  %v733_v37 = vld [vmem:[%s3456_s27 + $0x2] sm:$0xff]  ;;  %v735_v43 = vld [vmem:[%s3456_s27 + $0x12] sm:$0xff]  ;;  %v736_v44 = vld [vmem:[%s3456_s27 + $0x1a] sm:$0xf]  ;;  %s4524_s27 = scalar_lea.hbm %s4574_s15, %s2722_s23  ;;  %p3209_p13 = pneg %p3208_p12 }
  0x26   : > { %926 = vmatpush1.msra.mxu1 %v906_v23  ;;  %2540 = vmatmul.mubr.msk.f32.gmra.mxu0 %vm517_vm1, %v505_v21  ;;  %v900_v41 = vld [vmem:[%s4563_s4 + $0x48] sm:$0xff]  ;;  %v899_v42 = vld [vmem:[%s4563_s4 + $0x40] sm:$0xff]  ;;  %v898_v45 = vld [vmem:[%s4563_s4 + $0x38] sm:$0xff]  ;;  %p3215_p2 = por %p3214_p1, %p3213_p0 }
  0x27   : > { %2546 = vmatmul.mubr.msk.f32.gmra.mxu1 %vm517_vm1, %v493_v22  ;;  %613 = vmatprep.mubr.f32.mxu0 %v3268_v16  ;;  %v897_v46 = vld [vmem:[%s4563_s4 + $0x30] sm:$0xff]  ;;  %v896_v47 = vld [vmem:[%s4563_s4 + $0x28] sm:$0xff]  ;;  %v895_v48 = vld [vmem:[%s4563_s4 + $0x20] sm:$0xff] }
  0x28   : > { %720 = vmatprep.mubr.f32.mxu1 %v3268_v16  ;;  %790 = vmatprep.subr.mxu0 %v2554_v24  ;;  %v894_v49 = vld [vmem:[%s4563_s4 + $0x18] sm:$0xff]  ;;  %v893_v50 = vld [vmem:[%s4563_s4 + $0x10] sm:$0xff]  ;;  %v892_v51 = vld [vmem:[%s4563_s4 + $0x8] sm:$0xff]  ;;  %p3216_p3 = pnand %p3215_p2, %p3209_p13 }
  0x29   : > { %927 = vmatprep.subr.mxu1 %v3268_v16  ;;  %791 = vmatpush1.msra.mxu0 %v2553_v25  ;;  %v891_v52 = vld [vmem:[%s4563_s4] sm:$0xff]  ;;  %v910_v54 = vld [vmem:[%s4563_s4 + $0x98] sm:$0xff]  ;;  %v909_v55 = vld [vmem:[%s4563_s4 + $0x90] sm:$0xff] }
  0x2a   : > { %928 = vmatpush1.msra.mxu1 %v905_v26  ;;  %2541 = vmatmul.mubr.msk.f32.gmra.mxu0 %vm517_vm1, %v506_v27  ;;  %v911_v53 = vld [vmem:[%s4563_s4 + $0xa0] sm:$0xff]  ;;  %v908_v56 = vld [vmem:[%s4563_s4 + $0x88] sm:$0xff]  ;;  %v1120_v63 = vld [vmem:[%s4564_s5 + $0x98] sm:$0xff] }
  0x2b   : > { %2547 = vmatmul.mubr.msk.f32.gmra.mxu1 %vm517_vm1, %v494_v28  ;;  %619 = vmatprep.mubr.f32.mxu0 %v3268_v16  ;;  %v907_v57 = vld [vmem:[%s4563_s4 + $0x80] sm:$0xff] }
  0x2c   : > { %726 = vmatprep.mubr.f32.mxu1 %v3268_v16  ;;  %792 = vmatprep.subr.mxu0 %v2552_v29  ;;  %v861_v8 = vld [vmem:[%s4561_s2] sm:$0x3] }
  0x2d   : > { %929 = vmatprep.subr.mxu1 %v3268_v16  ;;  %793 = vmatpush1.msra.mxu0 %v2551_v30  ;;  %v866_v14 = vrot.slane %v861_v8, %v865_v7  ;;  %v870_v18 = vrot.slane %v861_v8, %v869_v9  ;;  %v1113_v8 = vld [vmem:[%s4564_s5 + $0x60] sm:$0xff] }
  0x2e   : > { %930 = vmatpush1.msra.mxu1 %v904_v31  ;;  %2542 = vmatmul.mubr.msk.f32.gmra.mxu0 %vm517_vm1, %v507_v32 }
  0x2f   : > { %2548 = vmatmul.mubr.msk.f32.gmra.mxu1 %vm517_vm1, %v495_v33  ;;  %794 = vmatprep.subr.mxu0 %v2550_v34 }
  0x30   : > { %828 = vmatprep.mubr.f32.mxu0 %v3268_v16  ;;  %795 = vmatpush1.msra.mxu0 %v2549_v35 }
  0x31   : > { %931 = vmatprep.subr.mxu1 %v3268_v16 }
  0x32   : > { %932 = vmatpush1.msra.mxu1 %v903_v36  ;;  %2559 = vmatmul.mubr.msk.f32.vlgmr.msra.gmra.mxu0 %vm517_vm1, %v733_v37 }
  0x33   : > { %933 = vmatprep.subr.mxu1 %v3268_v16  ;;  %834 = vmatprep.mubr.f32.mxu0 %v3268_v16 }
  0x34   : > { %934 = vmatpush1.msra.mxu1 %v902_v38 }
  0x35   : > { %935 = vmatprep.subr.mxu1 %v3268_v16 }
  0x36   : > { %936 = vmatpush1.msra.mxu1 %v901_v39  ;;  %2560 = vmatmul.mubr.msk.f32.gmra.mxu0 %vm517_vm1, %v734_v40 }
  0x37   : > { %937 = vmatprep.subr.mxu1 %v3268_v16  ;;  %840 = vmatprep.mubr.f32.mxu0 %v3268_v16 }
  0x38   : > { %938 = vmatpush1.msra.mxu1 %v900_v41 }
  0x39   : > { %939 = vmatprep.subr.mxu1 %v3268_v16 }
  0x3a   : > { %940 = vmatpush1.msra.mxu1 %v899_v42  ;;  %2561 = vmatmul.mubr.msk.f32.gmra.mxu0 %vm517_vm1, %v735_v43 }
  0x3b   : > { %941 = vmatprep.subr.mxu1 %v3268_v16  ;;  %846 = vmatprep.mubr.f32.mxu0 %v3268_v16 }
  0x3c   : > { %942 = vmatpush1.msra.mxu1 %v898_v45 }
  0x3d   : > { %943 = vmatprep.subr.mxu1 %v3268_v16 }
  0x3e   : > { %2562 = vmatmul.mubr.msk.f32.gmra.mxu0 %vm517_vm1, %v736_v44  ;;  %944 = vmatpush1.msra.mxu1 %v897_v46 }
  0x3f   : > { %945 = vmatprep.subr.mxu1 %v3268_v16 }
  0x40   : > { %946 = vmatpush1.msra.mxu1 %v896_v47 }
  0x41   : > { %947 = vmatprep.subr.mxu1 %v3268_v16 }
  0x42   : > { %948 = vmatpush1.msra.mxu1 %v895_v48 }
  0x43   : > { %949 = vmatprep.subr.mxu1 %v3268_v16 }
  0x44   : > { %950 = vmatpush1.msra.mxu1 %v894_v49 }
  0x45   : > { %951 = vmatprep.subr.mxu1 %v3268_v16 }
  0x46   : > { %952 = vmatpush1.msra.mxu1 %v893_v50 }
  0x47   : > { %953 = vmatprep.subr.mxu1 %v3268_v16 }
  0x48   : > { %954 = vmatpush1.msra.mxu1 %v892_v51 }
  0x49   : > { %955 = vmatprep.subr.mxu1 %v3268_v16 }
  0x4a   : > { %956 = vmatpush1.msra.mxu1 %v891_v52 }
  0x4b   : > { %979 = vmatprep.subr.mxu1 %v3268_v16 }
  0x4c   : > { %980 = vmatpush2.msra.mxu1 %v911_v53 }
  0x4d   : > { %981 = vmatprep.subr.mxu1 %v3268_v16 }
  0x4e   : > { %982 = vmatpush2.msra.mxu1 %v910_v54 }
  0x4f   : > { %983 = vmatprep.subr.mxu1 %v3268_v16 }
  0x50   : > { %984 = vmatpush2.msra.mxu1 %v909_v55 }
  0x51   : > { %985 = vmatprep.subr.mxu1 %v3268_v16 }
  0x52   : > { %986 = vmatpush2.msra.mxu1 %v908_v56 }
  0x53   : > { %987 = vmatprep.subr.mxu1 %v3268_v16 }
  0x54   : > { %988 = vmatpush2.msra.mxu1 %v907_v57 }
  0xe2   : > { %v603_v58 = vpop.f32.mrf.mxu0 }
  0xe3   : > { %v710_v59 = vpop.f32.mrf.mxu1 }
  0xe4   : > { %v605_v60 = vpop.f32.mrf.mxu0  ;;  %v711_v12 = vadd.f32 %v710_v59, %v603_v58  ;;  %v889_v58 = vld [vmem:[%s4562_s3] sm:$0xff]  ;;  %v1124_v59 = vld [vmem:[%s4564_s5 + $0xb8] sm:$0xff] }
  0xe5   : > { %v712_v61 = vpop.f32.mrf.mxu1  ;;  %2876 = vmatprep.mubr.msk.f32.mxu0 %vm1010_vm3, %v889_v58  ;;  %1249 = vmatprep.subr.mxu1 %v1124_v59  ;;  %v2620_v59 = vld [vmem:[%s4564_s5 + $0x230] sm:$0xff] }
  0xe6   : > { %v609_v62 = vpop.f32.mrf.mxu0  ;;  %v713_v15 = vadd.f32 %v712_v61, %v605_v60  ;;  %v1123_v60 = vld [vmem:[%s4564_s5 + $0xb0] sm:$0xff]  ;;  %v1122_v61 = vld [vmem:[%s4564_s5 + $0xa8] sm:$0xff] }
  0xe7   : > { %v716_v0 = vpop.f32.mrf.mxu1 }
  0xe8   : > { %v611_v1 = vpop.f32.mrf.mxu0  ;;  %v717_v21 = vadd.f32 %v716_v0, %v609_v62  ;;  %v1121_v62 = vld [vmem:[%s4564_s5 + $0xa0] sm:$0xff]  ;;  %v1119_v0 = vld [vmem:[%s4564_s5 + $0x90] sm:$0xff] }
  0xe9   : > { %v718_v4 = vpop.f32.mrf.mxu1 }
  0xea   : > { %v615_v2 = vpop.f32.mrf.mxu0  ;;  %v719_v25 = vadd.f32 %v718_v4, %v611_v1  ;;  %v1118_v1 = vld [vmem:[%s4564_s5 + $0x88] sm:$0xff]  ;;  %v1116_v4 = vld [vmem:[%s4564_s5 + $0x78] sm:$0xff] }
  0xeb   : > { %v722_v10 = vpop.f32.mrf.mxu1 }
  0xec   : > { %v617_v5 = vpop.f32.mrf.mxu0  ;;  %v723_v30 = vadd.f32 %v722_v10, %v615_v2  ;;  %v1117_v2 = vld [vmem:[%s4564_s5 + $0x80] sm:$0xff]  ;;  %v1112_v10 = vld [vmem:[%s4564_s5 + $0x58] sm:$0xff] }
  0xed   : > { %v724_v19 = vpop.f32.mrf.mxu1 }
  0xee   : > { %v621_v6 = vpop.f32.mrf.mxu0  ;;  %v725_v36 = vadd.f32 %v724_v19, %v617_v5  ;;  %v1115_v5 = vld [vmem:[%s4564_s5 + $0x70] sm:$0xff] }
  0xef   : > { %v728_v28 = vpop.f32.mrf.mxu1 }
  0xf0   : > { %v623_v11 = vpop.f32.mrf.mxu0  ;;  %v729_v41 = vadd.f32 %v728_v28, %v621_v6  ;;  %v1114_v6 = vld [vmem:[%s4564_s5 + $0x68] sm:$0xff]  ;;  %v2586_v28 = vld [vmem:[%s4564_s5 + $0x140] sm:$0xff] }
  0xf1   : > { %v730_v39 = vpop.f32.mrf.mxu1 }
  0xf2   : > { %v830_v13 = vpop.f32.mrf.mxu0  ;;  %v731_v47 = vadd.f32 %v730_v39, %v623_v11  ;;  %v2577_v39 = vld [vmem:[%s4564_s5 + $0xf8] sm:$0xff] }
  0xf3   : > { %v853_v17 = vadd.f32 %v830_v13, %v711_v12 }
  0xf4   : > { %v832_v20 = vpop.f32.mrf.mxu0 }
  0xf5   : > { %v854_v22 = vadd.f32 %v832_v20, %v713_v15  ;;  %v873_v23 = vadd.f32 %v866_v14, %v853_v17  ;;  %v890_v20 = vld [vmem:[%s4562_s3 + $0x8] sm:$0xff] }
  0xf6   : > { %v836_v24 = vpop.f32.mrf.mxu0 }
  0xf7   : > { %v874_v26 = vadd.f32 %v870_v18, %v854_v22  ;;  %v855_v27 = vadd.f32 %v836_v24, %v717_v21  ;;  %v881_v33 = vmax.f32 %v873_v23, 0.0  ;;  %v2593_v21 = vld [vmem:[%s4564_s5 + $0x178] sm:$0xff]  ;;  %v2592_v22 = vld [vmem:[%s4564_s5 + $0x170] sm:$0xff]  ;;  %v2591_v23 = vld [vmem:[%s4564_s5 + $0x168] sm:$0xff] }
  0xf8   : > { %v838_v29 = vpop.f32.mrf.mxu0  ;;  %v2590_v24 = vld [vmem:[%s4564_s5 + $0x160] sm:$0xff] }
  0xf9   : > { %v882_v31 = vmax.f32 %v874_v26, 0.0  ;;  %v856_v32 = vadd.f32 %v838_v29, %v719_v25  ;;  %v875_v34 = vadd.f32 %v866_v14, %v855_v27  ;;  %v2589_v25 = vld [vmem:[%s4564_s5 + $0x158] sm:$0xff]  ;;  %v2588_v26 = vld [vmem:[%s4564_s5 + $0x150] sm:$0xff]  ;;  %v2587_v27 = vld [vmem:[%s4564_s5 + $0x148] sm:$0xff] }
  0xfa   : > { %v842_v35 = vpop.f32.mrf.mxu0  ;;  %v2585_v29 = vld [vmem:[%s4564_s5 + $0x138] sm:$0xff] }
  0xfb   : > { %v876_v37 = vadd.f32 %v870_v18, %v856_v32  ;;  %v857_v38 = vadd.f32 %v842_v35, %v723_v30  ;;  %2563 = vmatprep.mubr.msk.f32.mxu1 %vm912_vm2, %v882_v31  ;;  %v883_v44 = vmax.f32 %v875_v34, 0.0  ;;  %v2584_v30 = vld [vmem:[%s4564_s5 + $0x130] sm:$0xff]  ;;  %v2583_v31 = vld [vmem:[%s4564_s5 + $0x128] sm:$0xff]  ;;  %v2582_v32 = vld [vmem:[%s4564_s5 + $0x120] sm:$0xff] }
  0xfc   : > { %v844_v40 = vpop.f32.mrf.mxu0  ;;  %990 = vmatmul.mubr.f32.vlgmr.msra.gmra.mxu1 %v881_v33  ;;  %v2581_v33 = vld [vmem:[%s4564_s5 + $0x118] sm:$0xff]  ;;  %v2580_v34 = vld [vmem:[%s4564_s5 + $0x110] sm:$0xff]  ;;  %v2579_v35 = vld [vmem:[%s4564_s5 + $0x108] sm:$0xff] }
  0xfd   : > { %v884_v42 = vmax.f32 %v876_v37, 0.0  ;;  %v858_v43 = vadd.f32 %v844_v40, %v725_v36  ;;  %v877_v45 = vadd.f32 %v866_v14, %v857_v38  ;;  %1250 = vmatpush1.msra.mxu1 %v1123_v60  ;;  %v1111_v36 = vld [vmem:[%s4564_s5 + $0x50] sm:$0xff]  ;;  %v2578_v37 = vld [vmem:[%s4564_s5 + $0x100] sm:$0xff]  ;;  %v1110_v38 = vld [vmem:[%s4564_s5 + $0x48] sm:$0xff] }
  0xfe   : > { %v848_v46 = vpop.f32.mrf.mxu0  ;;  %1251 = vmatprep.subr.mxu1 %v1122_v61  ;;  %v1109_v40 = vld [vmem:[%s4564_s5 + $0x40] sm:$0xff] }
  0xff   : > { %v878_v48 = vadd.f32 %v870_v18, %v858_v43  ;;  %v859_v49 = vadd.f32 %v848_v46, %v729_v41  ;;  %2564 = vmatprep.mubr.msk.f32.mxu1 %vm912_vm2, %v884_v42  ;;  %v885_v53 = vmax.f32 %v877_v45, 0.0  ;;  %1252 = vmatpush1.msra.mxu1 %v1121_v62  ;;  %v2576_v41 = vld [vmem:[%s4564_s5 + $0xf0] sm:$0xff]  ;;  %v1108_v42 = vld [vmem:[%s4564_s5 + $0x38] sm:$0xff]  ;;  %v2575_v43 = vld [vmem:[%s4564_s5 + $0xe8] sm:$0xff] }
 0x100   : > { %v850_v50 = vpop.f32.mrf.mxu0  ;;  %995 = vmatmul.mubr.f32.gmra.mxu1 %v883_v44  ;;  %1253 = vmatprep.subr.mxu1 %v1120_v63  ;;  %v1107_v44 = vld [vmem:[%s4564_s5 + $0x30] sm:$0xff]  ;;  %v2574_v45 = vld [vmem:[%s4564_s5 + $0xe0] sm:$0xff]  ;;  %v1106_v46 = vld [vmem:[%s4564_s5 + $0x28] sm:$0xff] }
 0x101   : > { %v886_v51 = vmax.f32 %v878_v48, 0.0  ;;  %v860_v52 = vadd.f32 %v850_v50, %v731_v47  ;;  %v879_v54 = vadd.f32 %v866_v14, %v859_v49  ;;  %1254 = vmatpush1.msra.mxu1 %v1119_v0  ;;  %v2573_v47 = vld [vmem:[%s4564_s5 + $0xd8] sm:$0xff]  ;;  %v1105_v48 = vld [vmem:[%s4564_s5 + $0x20] sm:$0xff]  ;;  %v2572_v49 = vld [vmem:[%s4564_s5 + $0xd0] sm:$0xff] }
 0x102   : > { %1255 = vmatprep.subr.mxu1 %v1118_v1  ;;  %v1104_v50 = vld [vmem:[%s4564_s5 + $0x18] sm:$0xff]  ;;  %v2619_v62 = vld [vmem:[%s4564_s5 + $0x228] sm:$0xff]  ;;  %v2618_v63 = vld [vmem:[%s4564_s5 + $0x220] sm:$0xff] }
 0x103   : > { %v880_v55 = vadd.f32 %v870_v18, %v860_v52  ;;  %2565 = vmatprep.mubr.msk.f32.mxu1 %vm912_vm2, %v886_v51  ;;  %v887_v57 = vmax.f32 %v879_v54, 0.0  ;;  %1256 = vmatpush1.msra.mxu1 %v1117_v2  ;;  %v2571_v51 = vld [vmem:[%s4564_s5 + $0xc8] sm:$0xff]  ;;  %v1103_v52 = vld [vmem:[%s4564_s5 + $0x10] sm:$0xff]  ;;  %v1468_v0 = vld [vmem:[%s4567_s8 + $0x78] sm:$0xff] }
 0x104   : > { %1000 = vmatmul.mubr.f32.gmra.mxu1 %v885_v53  ;;  %1257 = vmatprep.subr.mxu1 %v1116_v4  ;;  %v2570_v53 = vld [vmem:[%s4564_s5 + $0xc0] sm:$0xff]  ;;  %v1102_v54 = vld [vmem:[%s4564_s5 + $0x8] sm:$0xff]  ;;  %v2617_v1 = vld [vmem:[%s4564_s5 + $0x218] sm:$0xff] }
 0x105   : > { %v888_v56 = vmax.f32 %v880_v55, 0.0  ;;  %1258 = vmatpush1.msra.mxu1 %v1115_v5  ;;  %v1101_v55 = vld [vmem:[%s4564_s5] sm:$0xff]  ;;  %v2616_v2 = vld [vmem:[%s4564_s5 + $0x210] sm:$0xff]  ;;  %v2615_v5 = vld [vmem:[%s4564_s5 + $0x208] sm:$0xff] }
 0x106   : > { %1259 = vmatprep.subr.mxu1 %v1114_v6 }
 0x107   : > { %2566 = vmatprep.mubr.msk.f32.mxu1 %vm912_vm2, %v888_v56  ;;  %1260 = vmatpush1.msra.mxu1 %v1113_v8  ;;  %v2621_v56 = vld [vmem:[%s4564_s5 + $0x238] sm:$0xff]  ;;  %v2614_v8 = vld [vmem:[%s4564_s5 + $0x200] sm:$0xff] }
 0x108   : > { %1005 = vmatmul.mubr.f32.gmra.mxu1 %v887_v57  ;;  %1261 = vmatprep.subr.mxu1 %v1112_v10  ;;  %v2613_v10 = vld [vmem:[%s4564_s5 + $0x1f8] sm:$0xff] }
 0x109   : > { %1305 = vmatprep.mubr.f32.mxu1 %v3268_v16  ;;  %1262 = vmatpush1.msra.mxu1 %v1111_v36 }
 0x10a   : > { %1263 = vmatprep.subr.mxu1 %v1110_v38 }
 0x10b   : > { %1264 = vmatpush1.msra.mxu1 %v1109_v40  ;;  %v1456_v40 = vld [vmem:[%s4567_s8 + $0x18] sm:$0xff] }
 0x10c   : > { %1265 = vmatprep.subr.mxu1 %v1108_v42  ;;  %v1454_v42 = vld [vmem:[%s4567_s8 + $0x8] sm:$0xff] }
 0x10d   : > { %1266 = vmatpush1.msra.mxu1 %v1107_v44  ;;  %v1480_v44 = vld [vmem:[%s4567_s8 + $0xd8] sm:$0xff] }
 0x10e   : > { %1267 = vmatprep.subr.mxu1 %v1106_v46  ;;  %v1478_v46 = vld [vmem:[%s4567_s8 + $0xc8] sm:$0xff] }
 0x10f   : > { %1268 = vmatpush1.msra.mxu1 %v1105_v48  ;;  %v1476_v48 = vld [vmem:[%s4567_s8 + $0xb8] sm:$0xff] }
 0x110   : > { %1269 = vmatprep.subr.mxu1 %v1104_v50  ;;  %v1474_v50 = vld [vmem:[%s4567_s8 + $0xa8] sm:$0xff] }
 0x111   : > { %1270 = vmatpush1.msra.mxu1 %v1103_v52  ;;  %v1472_v52 = vld [vmem:[%s4567_s8 + $0x98] sm:$0xff] }
 0x112   : > { %1271 = vmatprep.subr.mxu1 %v1102_v54  ;;  %v1470_v54 = vld [vmem:[%s4567_s8 + $0x88] sm:$0xff] }
 0x113   : > { %1272 = vmatpush1.msra.mxu1 %v1101_v55  ;;  %v1469_v55 = vld [vmem:[%s4567_s8 + $0x80] sm:$0xff] }
 0x114   : > { %1487 = vmatprep.subr.mxu1 %v3268_v16 }
 0x1bc   : > { %v991_v11 = vpop.f32.mrf.mxu1 }
 0x1be   : > { %v993_v12 = vpop.f32.mrf.mxu1 }
 0x1bf   : > { %v2612_v12 = vld [vmem:[%s4564_s5 + $0x1f0] sm:$0xff] }
 0x1c0   : > { %v996_v13 = vpop.f32.mrf.mxu1 }
 0x1c2   : > { %v998_v14 = vpop.f32.mrf.mxu1 }
 0x1c3   : > { %v1466_v14 = vld [vmem:[%s4567_s8 + $0x68] sm:$0xff] }
 0x1c4   : > { %v1001_v15 = vpop.f32.mrf.mxu1 }
 0x1c6   : > { %v1003_v17 = vpop.f32.mrf.mxu1 }
 0x1c7   : > { %v2609_v17 = vld [vmem:[%s4564_s5 + $0x1d8] sm:$0xff] }
 0x1c8   : > { %v1006_v18 = vpop.f32.mrf.mxu1 }
 0x1c9   : > { %2868 = vmatprep.subr.msk.mxu0 %vm1017_vm4, %v1006_v18 }
 0x1ca   : > { %v1008_v19 = vpop.f32.mrf.mxu1  ;;  %2869 = vmatpush3.msk.msra.mxu0 %vm1017_vm4, %v1006_v18  ;;  %v1465_v18 = vld [vmem:[%s4567_s8 + $0x60] sm:$0xff] }
 0x1cb   : > { %2870 = vmatprep.subr.mxu0 %v1001_v15  ;;  %v2608_v19 = vld [vmem:[%s4564_s5 + $0x1d0] sm:$0xff] }
 0x1cc   : > { %2871 = vmatpush3.msra.mxu0 %v1001_v15  ;;  %v2610_v15 = vld [vmem:[%s4564_s5 + $0x1e0] sm:$0xff] }
 0x1cd   : > { %2872 = vmatprep.subr.mxu0 %v996_v13 }
 0x1ce   : > { %2873 = vmatpush3.msra.mxu0 %v996_v13  ;;  %v2611_v13 = vld [vmem:[%s4564_s5 + $0x1e8] sm:$0xff] }
 0x1cf   : > { %2874 = vmatprep.subr.mxu0 %v991_v11 }
 0x1d0   : > { %2875 = vmatpush3.msra.mxu0 %v991_v11  ;;  %v1467_v11 = vld [vmem:[%s4567_s8 + $0x70] sm:$0xff] }
 0x1d1   : > { %2877 = vmatmul.mubr.msk.f32.vlgmr.msra.gmra.mxu0 %vm1010_vm3, %v890_v20  ;;  %1166 = vmatprep.subr.mxu0 %v2593_v21  ;;  %v2607_v20 = vld [vmem:[%s4564_s5 + $0x1c8] sm:$0xff]  ;;  %v1464_v21 = vld [vmem:[%s4567_s8 + $0x58] sm:$0xff] }
 0x1d2   : > { %1167 = vmatpush1.msra.mxu0 %v2592_v22  ;;  %1222 = vmatprep.mubr.f32.mxu0 %v3268_v16  ;;  %v2606_v22 = vld [vmem:[%s4564_s5 + $0x1c0] sm:$0xff] }
 0x1d3   : > { %1168 = vmatprep.subr.mxu0 %v2591_v23  ;;  %v2605_v23 = vld [vmem:[%s4564_s5 + $0x1b8] sm:$0xff] }
 0x1d4   : > { %1169 = vmatpush1.msra.mxu0 %v2590_v24  ;;  %v1463_v24 = vld [vmem:[%s4567_s8 + $0x50] sm:$0xff] }
 0x1d5   : > { %1170 = vmatprep.subr.mxu0 %v2589_v25  ;;  %v2604_v25 = vld [vmem:[%s4564_s5 + $0x1b0] sm:$0xff] }
 0x1d6   : > { %1171 = vmatpush1.msra.mxu0 %v2588_v26  ;;  %v2603_v26 = vld [vmem:[%s4564_s5 + $0x1a8] sm:$0xff] }
 0x1d7   : > { %1172 = vmatprep.subr.mxu0 %v2587_v27  ;;  %v1462_v27 = vld [vmem:[%s4567_s8 + $0x48] sm:$0xff] }
 0x1d8   : > { %1173 = vmatpush1.msra.mxu0 %v2586_v28  ;;  %v2602_v28 = vld [vmem:[%s4564_s5 + $0x1a0] sm:$0xff] }
 0x1d9   : > { %1174 = vmatprep.subr.mxu0 %v2585_v29  ;;  %v2601_v29 = vld [vmem:[%s4564_s5 + $0x198] sm:$0xff] }
 0x1da   : > { %1175 = vmatpush1.msra.mxu0 %v2584_v30  ;;  %v1461_v30 = vld [vmem:[%s4567_s8 + $0x40] sm:$0xff] }
 0x1db   : > { %1176 = vmatprep.subr.mxu0 %v2583_v31  ;;  %v2600_v31 = vld [vmem:[%s4564_s5 + $0x190] sm:$0xff] }
 0x1dc   : > { %1177 = vmatpush1.msra.mxu0 %v2582_v32  ;;  %v2599_v32 = vld [vmem:[%s4564_s5 + $0x188] sm:$0xff] }
 0x1dd   : > { %1178 = vmatprep.subr.mxu0 %v2581_v33  ;;  %v1460_v33 = vld [vmem:[%s4567_s8 + $0x38] sm:$0xff] }
 0x1de   : > { %1179 = vmatpush1.msra.mxu0 %v2580_v34  ;;  %v2598_v34 = vld [vmem:[%s4564_s5 + $0x180] sm:$0xff] }
 0x1df   : > { %1180 = vmatprep.subr.mxu0 %v2579_v35  ;;  %v1459_v35 = vld [vmem:[%s4567_s8 + $0x30] sm:$0xff] }
 0x1e0   : > { %1181 = vmatpush1.msra.mxu0 %v2578_v37  ;;  %v1458_v37 = vld [vmem:[%s4567_s8 + $0x28] sm:$0xff] }
 0x1e1   : > { %1182 = vmatprep.subr.mxu0 %v2577_v39  ;;  %v1457_v39 = vld [vmem:[%s4567_s8 + $0x20] sm:$0xff] }
 0x1e2   : > { %1183 = vmatpush1.msra.mxu0 %v2576_v41  ;;  %v1455_v41 = vld [vmem:[%s4567_s8 + $0x10] sm:$0xff] }
 0x1e3   : > { %1184 = vmatprep.subr.mxu0 %v2575_v43  ;;  %v1453_v43 = vld [vmem:[%s4567_s8] sm:$0xff] }
 0x1e4   : > { %1185 = vmatpush1.msra.mxu0 %v2574_v45  ;;  %v1479_v45 = vld [vmem:[%s4567_s8 + $0xd0] sm:$0xff] }
 0x1e5   : > { %1186 = vmatprep.subr.mxu0 %v2573_v47  ;;  %v1477_v47 = vld [vmem:[%s4567_s8 + $0xc0] sm:$0xff] }
 0x1e6   : > { %1187 = vmatpush1.msra.mxu0 %v2572_v49  ;;  %v1475_v49 = vld [vmem:[%s4567_s8 + $0xb0] sm:$0xff] }
 0x1e7   : > { %1188 = vmatprep.subr.mxu0 %v2571_v51  ;;  %v1473_v51 = vld [vmem:[%s4567_s8 + $0xa0] sm:$0xff] }
 0x1e8   : > { %1189 = vmatpush1.msra.mxu0 %v2570_v53  ;;  %v1471_v53 = vld [vmem:[%s4567_s8 + $0x90] sm:$0xff] }
 0x1e9   : > { %1359 = vmatprep.subr.mxu0 %v2621_v56 }
 0x291   : > { %v2878_v57 = vpop.f32.mrf.mxu0 }
 0x292   : > { %1098 = vst.msk [vmem:[#allocation2 + $0x8] sm:$0xff] %vm1096_vm5, %v2878_v57 }
 0x293   : > { %v1087_v58 = vpop.f32.mrf.mxu0 }
 0x294   : > { %1097 = vst.msk [vmem:[#allocation2] sm:$0xff] %vm1096_vm5, %v1087_v58 }
 0x299   : > { %v1126_v4 = vld [vmem:[#allocation2 + $0x9] sm:$0x3f] }
 0x29a   : > { %v1100_v6 = vld [vmem:[#allocation2 + $0x8] sm:$0x3f] }
 0x29b   : > { %v1125_v60 = vld [vmem:[#allocation2 + $0x1] sm:$0xff]  ;;  %v1319_v38 = vld [vmem:[#allocation2 + $0xa] sm:$0x3f] }
 0x29c   : > { %v1099_v61 = vld [vmem:[#allocation2] sm:$0xff]  ;;  %2594 = vmatmul.mubr.msk.f32.vlgmr.msra.gmra.mxu0 %vm1096_vm5, %v1125_v60 }
 0x29d   : > { %2596 = vmatmul.mubr.msk.f32.vlgmr.msra.gmra.mxu1 %vm1096_vm5, %v1099_v61  ;;  %1360 = vmatpush1.msra.mxu0 %v2620_v59  ;;  %v1318_v36 = vld [vmem:[#allocation2 + $0x2] sm:$0xff]  ;;  %v1432_v61 = vld [vmem:[%s4565_s6] sm:$0x3] }
 0x29e   : > { %1228 = vmatprep.mubr.f32.mxu0 %v3268_v16  ;;  %1361 = vmatprep.subr.mxu0 %v2619_v62 }
 0x29f   : > { %1311 = vmatprep.mubr.f32.mxu1 %v3268_v16  ;;  %1362 = vmatpush1.msra.mxu0 %v2618_v63 }
 0x2a0   : > { %1488 = vmatpush1.msra.mxu1 %v1468_v0  ;;  %1363 = vmatprep.subr.mxu0 %v2617_v1 }
 0x2a1   : > { %2595 = vmatmul.mubr.msk.f32.gmra.mxu0 %vm1096_vm5, %v1126_v4  ;;  %2597 = vmatmul.mubr.msk.f32.gmra.mxu1 %vm1096_vm5, %v1100_v6  ;;  %v1441_v6 = vrot.slane %v1432_v61, %v869_v9 }
 0x2a2   : > { %1364 = vmatpush1.msra.mxu0 %v2616_v2  ;;  %1415 = vmatprep.mubr.f32.mxu0 %v3268_v16  ;;  %v1437_v2 = vrot.slane %v1432_v61, %v865_v7 }
 0x2a3   : > { %1365 = vmatprep.subr.mxu0 %v2615_v5  ;;  %1489 = vmatprep.subr.mxu1 %v3268_v16 }
 0x2a4   : > { %1366 = vmatpush1.msra.mxu0 %v2614_v8  ;;  %1490 = vmatpush1.msra.mxu1 %v1467_v11 }
 0x2a5   : > { %1367 = vmatprep.subr.mxu0 %v2613_v10  ;;  %1491 = vmatprep.subr.mxu1 %v3268_v16 }
 0x2a6   : > { %1368 = vmatpush1.msra.mxu0 %v2612_v12  ;;  %1492 = vmatpush1.msra.mxu1 %v1466_v14 }
 0x2a7   : > { %1369 = vmatprep.subr.mxu0 %v2611_v13  ;;  %1493 = vmatprep.subr.mxu1 %v3268_v16 }
 0x2a8   : > { %1370 = vmatpush1.msra.mxu0 %v2610_v15  ;;  %1494 = vmatpush1.msra.mxu1 %v1465_v18 }
 0x2a9   : > { %1371 = vmatprep.subr.mxu0 %v2609_v17  ;;  %1495 = vmatprep.subr.mxu1 %v3268_v16 }
 0x2aa   : > { %1372 = vmatpush1.msra.mxu0 %v2608_v19  ;;  %1496 = vmatpush1.msra.mxu1 %v1464_v21 }
 0x2ab   : > { %1373 = vmatprep.subr.mxu0 %v2607_v20  ;;  %1497 = vmatprep.subr.mxu1 %v3268_v16 }
 0x2ac   : > { %1374 = vmatpush1.msra.mxu0 %v2606_v22  ;;  %1498 = vmatpush1.msra.mxu1 %v1463_v24  ;;  %v2657_v24 = vld [vmem:[%s4568_s9 + $0x148] sm:$0xff] }
 0x2ad   : > { %1375 = vmatprep.subr.mxu0 %v2605_v23  ;;  %1499 = vmatprep.subr.mxu1 %v3268_v16 }
 0x2ae   : > { %1376 = vmatpush1.msra.mxu0 %v2604_v25  ;;  %1500 = vmatpush1.msra.mxu1 %v1462_v27  ;;  %v2656_v25 = vld [vmem:[%s4568_s9 + $0x140] sm:$0xff]  ;;  %v2654_v27 = vld [vmem:[%s4568_s9 + $0x130] sm:$0xff] }
 0x2af   : > { %1377 = vmatprep.subr.mxu0 %v2603_v26  ;;  %1501 = vmatprep.subr.mxu1 %v3268_v16  ;;  %v2655_v26 = vld [vmem:[%s4568_s9 + $0x138] sm:$0xff] }
 0x2b0   : > { %1378 = vmatpush1.msra.mxu0 %v2602_v28  ;;  %1502 = vmatpush1.msra.mxu1 %v1461_v30  ;;  %v2653_v28 = vld [vmem:[%s4568_s9 + $0x128] sm:$0xff]  ;;  %v2651_v30 = vld [vmem:[%s4568_s9 + $0x118] sm:$0xff] }
 0x2b1   : > { %1379 = vmatprep.subr.mxu0 %v2601_v29  ;;  %1503 = vmatprep.subr.mxu1 %v3268_v16  ;;  %v2652_v29 = vld [vmem:[%s4568_s9 + $0x120] sm:$0xff] }
 0x2b2   : > { %1380 = vmatpush1.msra.mxu0 %v2600_v31  ;;  %1504 = vmatpush1.msra.mxu1 %v1460_v33  ;;  %v2650_v31 = vld [vmem:[%s4568_s9 + $0x110] sm:$0xff]  ;;  %v2648_v33 = vld [vmem:[%s4568_s9 + $0x100] sm:$0xff] }
 0x2b3   : > { %1381 = vmatprep.subr.mxu0 %v2599_v32  ;;  %1505 = vmatprep.subr.mxu1 %v3268_v16  ;;  %v2649_v32 = vld [vmem:[%s4568_s9 + $0x108] sm:$0xff] }
 0x2b4   : > { %1382 = vmatpush1.msra.mxu0 %v2598_v34  ;;  %1506 = vmatpush1.msra.mxu1 %v1459_v35 }
 0x2b5   : > { %2622 = vmatmul.mubr.msk.f32.vlgmr.msra.gmra.mxu0 %vm1096_vm5, %v1318_v36  ;;  %1507 = vmatprep.subr.mxu1 %v3268_v16 }
 0x2b6   : > { %1421 = vmatprep.mubr.f32.mxu0 %v3268_v16  ;;  %1508 = vmatpush1.msra.mxu1 %v1458_v37  ;;  %v1452_v37 = vld [vmem:[%s4566_s7] sm:$0x7f] }
 0x2b7   : > { %2879 = vmatprep.subr.mxu0 %v3268_v16  ;;  %1509 = vmatprep.subr.mxu1 %v3268_v16 }
 0x2b8   : > { %1510 = vmatpush1.msra.mxu1 %v1457_v39  ;;  %v1656_v39 = vld [vmem:[%s4568_s9 + $0x68] sm:$0xff] }
 0x2b9   : > { %2623 = vmatmul.mubr.msk.f32.gmra.mxu0 %vm1096_vm5, %v1319_v38  ;;  %1511 = vmatprep.subr.mxu1 %v3268_v16 }
 0x2ba   : > { %1512 = vmatpush1.msra.mxu1 %v1456_v40  ;;  %2883 = vmatprep.mubr.msk.f32.mxu0 %vm3269_vm6, %v3268_v16  ;;  %v1655_v40 = vld [vmem:[%s4568_s9 + $0x60] sm:$0xff] }
 0x2bb   : > { %1513 = vmatprep.subr.mxu1 %v3268_v16 }
 0x2bc   : > { %1514 = vmatpush1.msra.mxu1 %v1455_v41  ;;  %v1654_v41 = vld [vmem:[%s4568_s9 + $0x58] sm:$0xff] }
 0x2bd   : > { %1515 = vmatprep.subr.mxu1 %v3268_v16 }
 0x2be   : > { %1516 = vmatpush1.msra.mxu1 %v1454_v42  ;;  %v1653_v42 = vld [vmem:[%s4568_s9 + $0x50] sm:$0xff] }
 0x2bf   : > { %1517 = vmatprep.subr.mxu1 %v3268_v16 }
 0x2c0   : > { %1518 = vmatpush1.msra.mxu1 %v1453_v43  ;;  %v1652_v43 = vld [vmem:[%s4568_s9 + $0x48] sm:$0xff] }
 0x2c1   : > { %1527 = vmatprep.subr.mxu1 %v3268_v16 }
 0x2c2   : > { %1528 = vmatpush2.msra.mxu1 %v1480_v44  ;;  %v1651_v44 = vld [vmem:[%s4568_s9 + $0x40] sm:$0xff] }
 0x2c3   : > { %1529 = vmatprep.subr.mxu1 %v3268_v16 }
 0x2c4   : > { %1530 = vmatpush2.msra.mxu1 %v1479_v45  ;;  %v1650_v45 = vld [vmem:[%s4568_s9 + $0x38] sm:$0xff] }
 0x2c5   : > { %1531 = vmatprep.subr.mxu1 %v3268_v16 }
 0x2c6   : > { %1532 = vmatpush2.msra.mxu1 %v1478_v46  ;;  %v1649_v46 = vld [vmem:[%s4568_s9 + $0x30] sm:$0xff] }
 0x2c7   : > { %1533 = vmatprep.subr.mxu1 %v3268_v16 }
 0x2c8   : > { %1534 = vmatpush2.msra.mxu1 %v1477_v47  ;;  %v1648_v47 = vld [vmem:[%s4568_s9 + $0x28] sm:$0xff] }
 0x2c9   : > { %1535 = vmatprep.subr.mxu1 %v3268_v16 }
 0x2ca   : > { %1536 = vmatpush2.msra.mxu1 %v1476_v48  ;;  %v1647_v48 = vld [vmem:[%s4568_s9 + $0x20] sm:$0xff] }
 0x2cb   : > { %1537 = vmatprep.subr.mxu1 %v3268_v16 }
 0x2cc   : > { %1538 = vmatpush2.msra.mxu1 %v1475_v49  ;;  %v1646_v49 = vld [vmem:[%s4568_s9 + $0x18] sm:$0xff] }
 0x2cd   : > { %1539 = vmatprep.subr.mxu1 %v3268_v16 }
 0x2ce   : > { %1540 = vmatpush2.msra.mxu1 %v1474_v50  ;;  %v2647_v50 = vld [vmem:[%s4568_s9 + $0xf8] sm:$0xff] }
 0x2cf   : > { %1541 = vmatprep.subr.mxu1 %v3268_v16 }
 0x2d0   : > { %1542 = vmatpush2.msra.mxu1 %v1473_v51  ;;  %v1645_v51 = vld [vmem:[%s4568_s9 + $0x10] sm:$0xff] }
 0x2d1   : > { %1543 = vmatprep.subr.mxu1 %v3268_v16 }
 0x2d2   : > { %1544 = vmatpush2.msra.mxu1 %v1472_v52  ;;  %v2646_v52 = vld [vmem:[%s4568_s9 + $0xf0] sm:$0xff] }
 0x2d3   : > { %1545 = vmatprep.subr.mxu1 %v3268_v16 }
 0x2d4   : > { %1546 = vmatpush2.msra.mxu1 %v1471_v53  ;;  %v1644_v53 = vld [vmem:[%s4568_s9 + $0x8] sm:$0xff] }
 0x2d5   : > { %1547 = vmatprep.subr.mxu1 %v3268_v16 }
 0x2d6   : > { %1548 = vmatpush2.msra.mxu1 %v1470_v54  ;;  %v2645_v54 = vld [vmem:[%s4568_s9 + $0xe8] sm:$0xff] }
 0x2d7   : > { %1549 = vmatprep.subr.mxu1 %v3268_v16 }
 0x2d8   : > { %1550 = vmatpush2.msra.mxu1 %v1469_v55  ;;  %v1643_v55 = vld [vmem:[%s4568_s9] sm:$0xff] }
 0x2d9   : > { %2948 = vmatprep.subr.mxu1 %v3268_v16 }
 0x35c   : > { %v1224_v56 = vpop.f32.mrf.mxu0 }
 0x35d   : > { %v1307_v57 = vpop.f32.mrf.mxu1 }
 0x35e   : > { %v1226_v58 = vpop.f32.mrf.mxu0  ;;  %v1308_v0 = vadd.f32 %v1307_v57, %v1224_v56  ;;  %v2644_v56 = vld [vmem:[%s4568_s9 + $0xe0] sm:$0xff] }
 0x35f   : > { %v1309_v59 = vpop.f32.mrf.mxu1 }
 0x360   : > { %v1310_v4 = vadd.f32 %v1309_v59, %v1226_v58  ;;  %v2642_v59 = vld [vmem:[%s4568_s9 + $0xd8] sm:$0xff] }
 0x361   : > { %v1230_v60 = vpop.f32.mrf.mxu0  ;;  %v1313_v62 = vpop.f32.mrf.mxu1 }
 0x362   : > { %v1314_v11 = vadd.f32 %v1313_v62, %v1230_v60  ;;  %v2687_v60 = vld [vmem:[%s4568_s9 + $0x228] sm:$0xff] }
 0x363   : > { %v1232_v63 = vpop.f32.mrf.mxu0  ;;  %v1315_v8 = vpop.f32.mrf.mxu1 }
 0x364   : > { %v1316_v15 = vadd.f32 %v1315_v8, %v1232_v63  ;;  %v2641_v63 = vld [vmem:[%s4568_s9 + $0xd0] sm:$0xff]  ;;  %v2683_v8 = vld [vmem:[%s4568_s9 + $0x208] sm:$0xff] }
 0x375   : > { %v1417_v1 = vpop.f32.mrf.mxu0 }
 0x376   : > { %v1428_v5 = vadd.f32 %v1417_v1, %v1308_v0  ;;  %v2686_v0 = vld [vmem:[%s4568_s9 + $0x220] sm:$0xff]  ;;  %v2640_v1 = vld [vmem:[%s4568_s9 + $0xc8] sm:$0xff] }
 0x377   : > { %v1419_v10 = vpop.f32.mrf.mxu0 }
 0x378   : > { %v1429_v12 = vadd.f32 %v1419_v10, %v1310_v4  ;;  %v1444_v13 = vadd.f32 %v1437_v2, %v1428_v5  ;;  %v2639_v4 = vld [vmem:[%s4568_s9 + $0xc0] sm:$0xff]  ;;  %v2684_v5 = vld [vmem:[%s4568_s9 + $0x210] sm:$0xff] }
 0x379   : > { %v1423_v14 = vpop.f32.mrf.mxu0  ;;  %v2637_v10 = vld [vmem:[%s4568_s9 + $0xb0] sm:$0xff] }
 0x37a   : > { %v1445_v17 = vadd.f32 %v1441_v6, %v1429_v12  ;;  %v1430_v18 = vadd.f32 %v1423_v14, %v1314_v11  ;;  %v1448_v22 = vmax.f32 %v1444_v13, 0.0  ;;  %v2682_v11 = vld [vmem:[%s4568_s9 + $0x200] sm:$0xff]  ;;  %v2636_v12 = vld [vmem:[%s4568_s9 + $0xa8] sm:$0xff]  ;;  %v2681_v13 = vld [vmem:[%s4568_s9 + $0x1f8] sm:$0xff] }
 0x37b   : > { %v1425_v19 = vpop.f32.mrf.mxu0  ;;  %v2635_v14 = vld [vmem:[%s4568_s9 + $0xa0] sm:$0xff] }
 0x37c   : > { %v1449_v20 = vmax.f32 %v1445_v17, 0.0  ;;  %v1431_v21 = vadd.f32 %v1425_v19, %v1316_v15  ;;  %v1446_v23 = vadd.f32 %v1437_v2, %v1430_v18  ;;  %v2685_v2 = vld [vmem:[%s4568_s9 + $0x218] sm:$0xff]  ;;  %v2680_v15 = vld [vmem:[%s4568_s9 + $0x1f0] sm:$0xff]  ;;  %v2679_v18 = vld [vmem:[%s4568_s9 + $0x1e8] sm:$0xff] }
 0x37d   : > { %v2634_v17 = vld [vmem:[%s4568_s9 + $0x98] sm:$0xff]  ;;  %v2633_v19 = vld [vmem:[%s4568_s9 + $0x90] sm:$0xff] }
 0x37e   : > { %v1447_v7 = vadd.f32 %v1441_v6, %v1431_v21  ;;  %2624 = vmatprep.mubr.msk.f32.mxu1 %vm1096_vm5, %v1449_v20  ;;  %v1450_v9 = vmax.f32 %v1446_v23, 0.0  ;;  %v2638_v6 = vld [vmem:[%s4568_s9 + $0xb8] sm:$0xff]  ;;  %v2678_v20 = vld [vmem:[%s4568_s9 + $0x1e0] sm:$0xff]  ;;  %v2632_v21 = vld [vmem:[%s4568_s9 + $0x88] sm:$0xff] }
 0x37f   : > { %1552 = vmatmul.mubr.f32.vlgmr.msra.gmra.mxu1 %v1448_v22  ;;  %v2677_v22 = vld [vmem:[%s4568_s9 + $0x1d8] sm:$0xff]  ;;  %v2631_v23 = vld [vmem:[%s4568_s9 + $0x80] sm:$0xff] }
 0x380   : > { %v1451_v3 = vmax.f32 %v1447_v7, 0.0  ;;  %2949 = vmatpush3.msra.mxu1 %v2657_v24  ;;  %v2676_v7 = vld [vmem:[%s4568_s9 + $0x1d0] sm:$0xff] }
 0x381   : > { %2950 = vmatprep.subr.mxu1 %v3268_v16  ;;  %v2629_v24 = vld [vmem:[%s4568_s9 + $0x70] sm:$0xff] }
 0x382   : > { %2625 = vmatprep.mubr.msk.f32.mxu1 %vm1096_vm5, %v1451_v3  ;;  %2951 = vmatpush3.msra.mxu1 %v2656_v25  ;;  %v2630_v3 = vld [vmem:[%s4568_s9 + $0x78] sm:$0xff]  ;;  %v2674_v25 = vld [vmem:[%s4568_s9 + $0x1c0] sm:$0xff] }
 0x383   : > { %1557 = vmatmul.mubr.f32.gmra.mxu1 %v1450_v9  ;;  %2952 = vmatprep.subr.mxu1 %v3268_v16  ;;  %v2675_v9 = vld [vmem:[%s4568_s9 + $0x1c8] sm:$0xff] }
 0x384   : > { %2976 = vmatprep.mubr.msk.f32.mxu1 %vm3269_vm6, %v3268_v16  ;;  %2953 = vmatpush3.msra.mxu1 %v2655_v26 }
 0x385   : > { %2954 = vmatprep.subr.mxu1 %v3268_v16 }
 0x386   : > { %2955 = vmatpush3.msra.mxu1 %v2654_v27  ;;  %v2672_v27 = vld [vmem:[%s4568_s9 + $0x1b8] sm:$0xff] }
 0x387   : > { %2956 = vmatprep.subr.mxu1 %v3268_v16 }
 0x388   : > { %2957 = vmatpush3.msra.mxu1 %v2653_v28  ;;  %v2717_v28 = vld [vmem:[%s4568_s9 + $0x308] sm:$0xff] }
 0x389   : > { %2958 = vmatprep.subr.mxu1 %v3268_v16 }
 0x38a   : > { %2959 = vmatpush3.msra.mxu1 %v2652_v29 }
 0x38b   : > { %2960 = vmatprep.subr.mxu1 %v3268_v16 }
 0x38c   : > { %2961 = vmatpush3.msra.mxu1 %v2651_v30  ;;  %v2671_v30 = vld [vmem:[%s4568_s9 + $0x1b0] sm:$0xff] }
 0x38d   : > { %2962 = vmatprep.subr.mxu1 %v3268_v16 }
 0x38e   : > { %2963 = vmatpush3.msra.mxu1 %v2650_v31  ;;  %v2716_v31 = vld [vmem:[%s4568_s9 + $0x300] sm:$0xff] }
 0x38f   : > { %2964 = vmatprep.subr.mxu1 %v3268_v16 }
 0x390   : > { %2965 = vmatpush3.msra.mxu1 %v2649_v32  ;;  %v2670_v32 = vld [vmem:[%s4568_s9 + $0x1a8] sm:$0xff] }
 0x391   : > { %2966 = vmatprep.subr.mxu1 %v3268_v16 }
 0x392   : > { %2967 = vmatpush3.msra.mxu1 %v2648_v33  ;;  %v2715_v33 = vld [vmem:[%s4568_s9 + $0x2f8] sm:$0xff] }
 0x393   : > { %2968 = vmatprep.subr.mxu1 %v3268_v16 }
 0x394   : > { %2969 = vmatpush3.msra.mxu1 %v2647_v50  ;;  %v2661_v50 = vld [vmem:[%s4568_s9 + $0x160] sm:$0xff] }
 0x395   : > { %2970 = vmatprep.subr.mxu1 %v3268_v16 }
 0x396   : > { %2971 = vmatpush3.msra.mxu1 %v2646_v52  ;;  %v2660_v52 = vld [vmem:[%s4568_s9 + $0x158] sm:$0xff] }
 0x397   : > { %2972 = vmatprep.subr.mxu1 %v3268_v16 }
 0x398   : > { %2973 = vmatpush3.msra.mxu1 %v2645_v54  ;;  %v2659_v54 = vld [vmem:[%s4568_s9 + $0x150] sm:$0xff] }
 0x399   : > { %2974 = vmatprep.subr.mxu1 %v3268_v16 }
 0x39a   : > { %2975 = vmatpush3.msra.mxu1 %v2644_v56  ;;  %v2702_v56 = vld [vmem:[%s4568_s9 + $0x298] sm:$0xff] }
 0x39b   : > { %3010 = vmatprep.subr.mxu1 %v3268_v16 }
 0x43f   : > { %v1553_v34 = vpop.f32.mrf.mxu1 }
 0x441   : > { %v1555_v35 = vpop.f32.mrf.mxu1 }
 0x442   : > { %v2714_v35 = vld [vmem:[%s4568_s9 + $0x2f0] sm:$0xff] }
 0x443   : > { %v1558_v36 = vpop.f32.mrf.mxu1 }
 0x444   : > { %2880 = vmatpush3.msk.msra.mxu0 %vm530_vm0, %v1558_v36  ;;  %v2668_v36 = vld [vmem:[%s4568_s9 + $0x198] sm:$0xff] }
 0x445   : > { %v1560_v38 = vpop.f32.mrf.mxu1  ;;  %2881 = vmatprep.subr.mxu0 %v3268_v16 }
 0x446   : > { %2882 = vmatpush3.msra.mxu0 %v1553_v34  ;;  %v2669_v34 = vld [vmem:[%s4568_s9 + $0x1a0] sm:$0xff]  ;;  %v2667_v38 = vld [vmem:[%s4568_s9 + $0x190] sm:$0xff] }
 0x447   : > { %2884 = vmatmul.mubr.msk.f32.vlgmr.msra.gmra.mxu0 %vm1562_vm7, %v1452_v37  ;;  %2886 = vmatprep.subr.mxu0 %v3268_v16  ;;  %v2713_v37 = vld [vmem:[%s4568_s9 + $0x2e8] sm:$0xff] }
 0x448   : > { %2887 = vmatpush3.msra.mxu0 %v1656_v39  ;;  %2914 = vmatprep.mubr.msk.f32.mxu0 %vm3269_vm6, %v3268_v16  ;;  %v2712_v39 = vld [vmem:[%s4568_s9 + $0x2e0] sm:$0xff] }
 0x449   : > { %2888 = vmatprep.subr.mxu0 %v3268_v16 }
 0x44a   : > { %2889 = vmatpush3.msra.mxu0 %v1655_v40  ;;  %v2666_v40 = vld [vmem:[%s4568_s9 + $0x188] sm:$0xff] }
 0x44b   : > { %2890 = vmatprep.subr.mxu0 %v3268_v16 }
 0x44c   : > { %2891 = vmatpush3.msra.mxu0 %v1654_v41  ;;  %v2711_v41 = vld [vmem:[%s4568_s9 + $0x2d8] sm:$0xff] }
 0x44d   : > { %2892 = vmatprep.subr.mxu0 %v3268_v16 }
 0x44e   : > { %2893 = vmatpush3.msra.mxu0 %v1653_v42  ;;  %v2665_v42 = vld [vmem:[%s4568_s9 + $0x180] sm:$0xff] }
 0x44f   : > { %2894 = vmatprep.subr.mxu0 %v3268_v16 }
 0x450   : > { %2895 = vmatpush3.msra.mxu0 %v1652_v43  ;;  %v2710_v43 = vld [vmem:[%s4568_s9 + $0x2d0] sm:$0xff] }
 0x451   : > { %2896 = vmatprep.subr.mxu0 %v3268_v16 }
 0x452   : > { %2897 = vmatpush3.msra.mxu0 %v1651_v44  ;;  %v2664_v44 = vld [vmem:[%s4568_s9 + $0x178] sm:$0xff] }
 0x453   : > { %2898 = vmatprep.subr.mxu0 %v3268_v16 }
 0x454   : > { %2899 = vmatpush3.msra.mxu0 %v1650_v45  ;;  %v2709_v45 = vld [vmem:[%s4568_s9 + $0x2c8] sm:$0xff] }
 0x455   : > { %2900 = vmatprep.subr.mxu0 %v3268_v16 }
 0x456   : > { %2901 = vmatpush3.msra.mxu0 %v1649_v46  ;;  %v2663_v46 = vld [vmem:[%s4568_s9 + $0x170] sm:$0xff] }
 0x457   : > { %2902 = vmatprep.subr.mxu0 %v3268_v16 }
 0x458   : > { %2903 = vmatpush3.msra.mxu0 %v1648_v47  ;;  %v2708_v47 = vld [vmem:[%s4568_s9 + $0x2c0] sm:$0xff] }
 0x459   : > { %2904 = vmatprep.subr.mxu0 %v3268_v16 }
 0x45a   : > { %2905 = vmatpush3.msra.mxu0 %v1647_v48  ;;  %v2662_v48 = vld [vmem:[%s4568_s9 + $0x168] sm:$0xff] }
 0x45b   : > { %2906 = vmatprep.subr.mxu0 %v3268_v16 }
 0x45c   : > { %2907 = vmatpush3.msra.mxu0 %v1646_v49  ;;  %v2707_v49 = vld [vmem:[%s4568_s9 + $0x2b8] sm:$0xff] }
 0x45d   : > { %2908 = vmatprep.subr.mxu0 %v3268_v16 }
 0x45e   : > { %2909 = vmatpush3.msra.mxu0 %v1645_v51  ;;  %v2706_v51 = vld [vmem:[%s4568_s9 + $0x2b0] sm:$0xff] }
 0x45f   : > { %2910 = vmatprep.subr.mxu0 %v3268_v16 }
 0x460   : > { %2911 = vmatpush3.msra.mxu0 %v1644_v53  ;;  %v2705_v53 = vld [vmem:[%s4568_s9 + $0x2a8] sm:$0xff] }
 0x461   : > { %2912 = vmatprep.subr.mxu0 %v3268_v16 }
 0x462   : > { %2913 = vmatpush3.msra.mxu0 %v1643_v55  ;;  %v2704_v55 = vld [vmem:[%s4568_s9 + $0x2a0] sm:$0xff] }
 0x463   : > { %2917 = vmatprep.subr.mxu0 %v3268_v16 }
 0x507   : > { %v1635_v57 = vpop.f32.mrf.mxu0 }
 0x508   : > { %1640 = vst.msk [vmem:[#allocation3] sm:$0x7f] %vm1639_vm8, %v1635_v57 }
 0x509   : > { %v2885_v58 = vpop.f32.mrf.mxu0 }
 0x50f   : > { %v1642_v61 = vld [vmem:[#allocation3] sm:$0x1]  ;;  %v1822_v62 = vld [vmem:[#allocation3 + $0x2] sm:$0x1]  ;;  %v1732_v26 = vld [vmem:[#allocation3 + $0x1] sm:$0x1] }
 0x510   : > { %2915 = vmatmul.mubr.msk.f32.vlgmr.msra.gmra.mxu0 %vm1657_vm9, %v1642_v61  ;;  %2977 = vmatmul.mubr.msk.f32.vlgmr.msra.gmra.mxu1 %vm1657_vm9, %v1822_v62  ;;  %v2002_v29 = vld [vmem:[#allocation3 + $0x4] sm:$0x1]  ;;  %v1912_v57 = vld [vmem:[#allocation3 + $0x3] sm:$0x1]  ;;  %v2182_v58 = vld [vmem:[#allocation3 + $0x6] sm:$0x1] }
 0x511   : > { %2918 = vmatpush3.msra.mxu0 %v2642_v59  ;;  %3011 = vmatpush3.msra.mxu1 %v2687_v60  ;;  %v2701_v59 = vld [vmem:[%s4568_s9 + $0x290] sm:$0xff]  ;;  %v2700_v60 = vld [vmem:[%s4568_s9 + $0x288] sm:$0xff]  ;;  %v2699_v61 = vld [vmem:[%s4568_s9 + $0x280] sm:$0xff] }
 0x512   : > { %2919 = vmatprep.subr.mxu0 %v3268_v16  ;;  %3012 = vmatprep.subr.mxu1 %v3268_v16  ;;  %v2698_v62 = vld [vmem:[%s4568_s9 + $0x278] sm:$0xff] }
 0x513   : > { %2920 = vmatpush3.msra.mxu0 %v2641_v63  ;;  %3013 = vmatpush3.msra.mxu1 %v2686_v0  ;;  %v2697_v63 = vld [vmem:[%s4568_s9 + $0x270] sm:$0xff]  ;;  %v2696_v0 = vld [vmem:[%s4568_s9 + $0x268] sm:$0xff] }
 0x514   : > { %2921 = vmatprep.subr.mxu0 %v3268_v16  ;;  %3014 = vmatprep.subr.mxu1 %v3268_v16 }
 0x515   : > { %2922 = vmatpush3.msra.mxu0 %v2640_v1  ;;  %3015 = vmatpush3.msra.mxu1 %v2685_v2  ;;  %v2695_v1 = vld [vmem:[%s4568_s9 + $0x260] sm:$0xff]  ;;  %v2694_v2 = vld [vmem:[%s4568_s9 + $0x258] sm:$0xff] }
 0x516   : > { %2923 = vmatprep.subr.mxu0 %v3268_v16  ;;  %3016 = vmatprep.subr.mxu1 %v3268_v16 }
 0x517   : > { %2924 = vmatpush3.msra.mxu0 %v2639_v4  ;;  %3017 = vmatpush3.msra.mxu1 %v2684_v5  ;;  %v2693_v4 = vld [vmem:[%s4568_s9 + $0x250] sm:$0xff]  ;;  %v2692_v5 = vld [vmem:[%s4568_s9 + $0x248] sm:$0xff] }
 0x518   : > { %2925 = vmatprep.subr.mxu0 %v3268_v16  ;;  %3018 = vmatprep.subr.mxu1 %v3268_v16 }
 0x519   : > { %2926 = vmatpush3.msra.mxu0 %v2638_v6  ;;  %3019 = vmatpush3.msra.mxu1 %v2683_v8  ;;  %v2691_v6 = vld [vmem:[%s4568_s9 + $0x240] sm:$0xff]  ;;  %v2690_v8 = vld [vmem:[%s4568_s9 + $0x238] sm:$0xff] }
 0x51a   : > { %2927 = vmatprep.subr.mxu0 %v3268_v16  ;;  %3020 = vmatprep.subr.mxu1 %v3268_v16 }
 0x51b   : > { %2928 = vmatpush3.msra.mxu0 %v2637_v10  ;;  %3021 = vmatpush3.msra.mxu1 %v2682_v11  ;;  %v2689_v10 = vld [vmem:[%s4568_s9 + $0x230] sm:$0xff] }
 0x51c   : > { %2929 = vmatprep.subr.mxu0 %v3268_v16  ;;  %3022 = vmatprep.subr.mxu1 %v3268_v16  ;;  %v2092_v11 = vld [vmem:[#allocation3 + $0x5] sm:$0x1] }
 0x51d   : > { %2930 = vmatpush3.msra.mxu0 %v2636_v12  ;;  %3023 = vmatpush3.msra.mxu1 %v2681_v13  ;;  %v2287_v12 = vld [vmem:[%s4570_s11 + $0x70] sm:$0xff]  ;;  %v2286_v13 = vld [vmem:[%s4570_s11 + $0x68] sm:$0xff] }
 0x51e   : > { %2931 = vmatprep.subr.mxu0 %v3268_v16  ;;  %3024 = vmatprep.subr.mxu1 %v3268_v16 }
 0x51f   : > { %2932 = vmatpush3.msra.mxu0 %v2635_v14  ;;  %3025 = vmatpush3.msra.mxu1 %v2680_v15  ;;  %v2285_v14 = vld [vmem:[%s4570_s11 + $0x60] sm:$0xff]  ;;  %v2284_v15 = vld [vmem:[%s4570_s11 + $0x58] sm:$0xff] }
 0x520   : > { %2933 = vmatprep.subr.mxu0 %v3268_v16  ;;  %3026 = vmatprep.subr.mxu1 %v3268_v16 }
 0x521   : > { %2934 = vmatpush3.msra.mxu0 %v2634_v17  ;;  %3027 = vmatpush3.msra.mxu1 %v2679_v18  ;;  %v2283_v17 = vld [vmem:[%s4570_s11 + $0x50] sm:$0xff]  ;;  %v2282_v18 = vld [vmem:[%s4570_s11 + $0x48] sm:$0xff] }
 0x522   : > { %2935 = vmatprep.subr.mxu0 %v3268_v16  ;;  %3028 = vmatprep.subr.mxu1 %v3268_v16 }
 0x523   : > { %2936 = vmatpush3.msra.mxu0 %v2633_v19  ;;  %3029 = vmatpush3.msra.mxu1 %v2678_v20  ;;  %v2281_v19 = vld [vmem:[%s4570_s11 + $0x40] sm:$0xff]  ;;  %v2280_v20 = vld [vmem:[%s4570_s11 + $0x38] sm:$0xff] }
 0x524   : > { %2937 = vmatprep.subr.mxu0 %v3268_v16  ;;  %3030 = vmatprep.subr.mxu1 %v3268_v16 }
 0x525   : > { %2938 = vmatpush3.msra.mxu0 %v2632_v21  ;;  %3031 = vmatpush3.msra.mxu1 %v2677_v22  ;;  %v2279_v21 = vld [vmem:[%s4570_s11 + $0x30] sm:$0xff]  ;;  %v2278_v22 = vld [vmem:[%s4570_s11 + $0x28] sm:$0xff] }
 0x526   : > { %2939 = vmatprep.subr.mxu0 %v3268_v16  ;;  %3032 = vmatprep.subr.mxu1 %v3268_v16 }
 0x527   : > { %2940 = vmatpush3.msra.mxu0 %v2631_v23  ;;  %3033 = vmatpush3.msra.mxu1 %v2676_v7  ;;  %v2277_v23 = vld [vmem:[%s4570_s11 + $0x20] sm:$0xff]  ;;  %v2276_v7 = vld [vmem:[%s4570_s11 + $0x18] sm:$0xff] }
 0x528   : > { %2941 = vmatprep.subr.mxu0 %v3268_v16  ;;  %3034 = vmatprep.subr.mxu1 %v3268_v16 }
 0x529   : > { %2942 = vmatpush3.msra.mxu0 %v2630_v3  ;;  %3035 = vmatpush3.msra.mxu1 %v2675_v9  ;;  %v2275_v3 = vld [vmem:[%s4570_s11 + $0x10] sm:$0xff]  ;;  %v2274_v9 = vld [vmem:[%s4570_s11 + $0x8] sm:$0xff] }
 0x52a   : > { %2943 = vmatprep.subr.mxu0 %v3268_v16  ;;  %3036 = vmatprep.subr.mxu1 %v3268_v16 }
 0x52b   : > { %2944 = vmatpush3.msra.mxu0 %v2629_v24  ;;  %2945 = vmatprep.mubr.msk.f32.mxu0 %vm3269_vm6, %v3268_v16  ;;  %v2273_v24 = vld [vmem:[%s4570_s11] sm:$0xff] }
 0x52c   : > { %3037 = vmatpush3.msra.mxu1 %v2674_v25  ;;  %3038 = vmatprep.mubr.msk.f32.mxu1 %vm3269_vm6, %v3268_v16  ;;  %v2374_v25 = vld [vmem:[%s4572_s13 + $0x50] sm:$0xf] }
 0x52d   : > { %2946 = vmatmul.mubr.msk.f32.vlgmr.msra.gmra.mxu0 %vm1657_vm9, %v1732_v26  ;;  %2979 = vmatprep.subr.mxu0 %v3268_v16  ;;  %v2373_v26 = vld [vmem:[%s4572_s13 + $0x48] sm:$0xff] }
 0x52e   : > { %3039 = vmatmul.mubr.msk.f32.vlgmr.msra.gmra.mxu1 %vm1657_vm9, %v2002_v29  ;;  %3072 = vmatprep.subr.mxu1 %v3268_v16 }
 0x52f   : > { %2980 = vmatpush3.msra.mxu0 %v2672_v27  ;;  %3073 = vmatpush3.msra.mxu1 %v2717_v28 }
 0x530   : > { %2981 = vmatprep.subr.mxu0 %v3268_v16  ;;  %3074 = vmatprep.subr.mxu1 %v3268_v16 }
 0x531   : > { %2982 = vmatpush3.msra.mxu0 %v2671_v30  ;;  %3075 = vmatpush3.msra.mxu1 %v2716_v31  ;;  %v1641_v31 = vld [vmem:[%s4569_s10] sm:$0x1] }
 0x532   : > { %2983 = vmatprep.subr.mxu0 %v3268_v16  ;;  %3076 = vmatprep.subr.mxu1 %v3268_v16 }
 0x533   : > { %2984 = vmatpush3.msra.mxu0 %v2670_v32  ;;  %3077 = vmatpush3.msra.mxu1 %v2715_v33 }
 0x534   : > { %2985 = vmatprep.subr.mxu0 %v3268_v16  ;;  %3078 = vmatprep.subr.mxu1 %v3268_v16 }
 0x535   : > { %2986 = vmatpush3.msra.mxu0 %v2669_v34  ;;  %3079 = vmatpush3.msra.mxu1 %v2714_v35 }
 0x536   : > { %2987 = vmatprep.subr.mxu0 %v3268_v16  ;;  %3080 = vmatprep.subr.mxu1 %v3268_v16 }
 0x537   : > { %2988 = vmatpush3.msra.mxu0 %v2668_v36  ;;  %3081 = vmatpush3.msra.mxu1 %v2713_v37 }
 0x538   : > { %2989 = vmatprep.subr.mxu0 %v3268_v16  ;;  %3082 = vmatprep.subr.mxu1 %v3268_v16 }
 0x539   : > { %2990 = vmatpush3.msra.mxu0 %v2667_v38  ;;  %3083 = vmatpush3.msra.mxu1 %v2712_v39 }
 0x53a   : > { %2991 = vmatprep.subr.mxu0 %v3268_v16  ;;  %3084 = vmatprep.subr.mxu1 %v3268_v16 }
 0x53b   : > { %2992 = vmatpush3.msra.mxu0 %v2666_v40  ;;  %3085 = vmatpush3.msra.mxu1 %v2711_v41 }
 0x53c   : > { %2993 = vmatprep.subr.mxu0 %v3268_v16  ;;  %3086 = vmatprep.subr.mxu1 %v3268_v16 }
 0x53d   : > { %2994 = vmatpush3.msra.mxu0 %v2665_v42  ;;  %3087 = vmatpush3.msra.mxu1 %v2710_v43 }
 0x53e   : > { %2995 = vmatprep.subr.mxu0 %v3268_v16  ;;  %3088 = vmatprep.subr.mxu1 %v3268_v16 }
 0x53f   : > { %2996 = vmatpush3.msra.mxu0 %v2664_v44  ;;  %3089 = vmatpush3.msra.mxu1 %v2709_v45 }
 0x540   : > { %2997 = vmatprep.subr.mxu0 %v3268_v16  ;;  %3090 = vmatprep.subr.mxu1 %v3268_v16 }
 0x541   : > { %2998 = vmatpush3.msra.mxu0 %v2663_v46  ;;  %3091 = vmatpush3.msra.mxu1 %v2708_v47 }
 0x542   : > { %2999 = vmatprep.subr.mxu0 %v3268_v16  ;;  %3092 = vmatprep.subr.mxu1 %v3268_v16 }
 0x543   : > { %3000 = vmatpush3.msra.mxu0 %v2662_v48  ;;  %3093 = vmatpush3.msra.mxu1 %v2707_v49 }
 0x544   : > { %3001 = vmatprep.subr.mxu0 %v3268_v16  ;;  %3094 = vmatprep.subr.mxu1 %v3268_v16 }
 0x545   : > { %3002 = vmatpush3.msra.mxu0 %v2661_v50  ;;  %3095 = vmatpush3.msra.mxu1 %v2706_v51  ;;  %v2372_v50 = vld [vmem:[%s4572_s13 + $0x40] sm:$0xff]  ;;  %v2371_v51 = vld [vmem:[%s4572_s13 + $0x38] sm:$0xff] }
 0x546   : > { %3003 = vmatprep.subr.mxu0 %v3268_v16  ;;  %3096 = vmatprep.subr.mxu1 %v3268_v16 }
 0x547   : > { %3004 = vmatpush3.msra.mxu0 %v2660_v52  ;;  %3097 = vmatpush3.msra.mxu1 %v2705_v53  ;;  %v2370_v52 = vld [vmem:[%s4572_s13 + $0x30] sm:$0xff]  ;;  %v2369_v53 = vld [vmem:[%s4572_s13 + $0x28] sm:$0xff] }
 0x548   : > { %3005 = vmatprep.subr.mxu0 %v3268_v16  ;;  %3098 = vmatprep.subr.mxu1 %v3268_v16 }
 0x549   : > { %3006 = vmatpush3.msra.mxu0 %v2659_v54  ;;  %3007 = vmatprep.mubr.msk.f32.mxu0 %vm3269_vm6, %v3268_v16  ;;  %v2368_v54 = vld [vmem:[%s4572_s13 + $0x20] sm:$0xff] }
 0x54a   : > { %3099 = vmatpush3.msra.mxu1 %v2704_v55  ;;  %3100 = vmatprep.mubr.msk.f32.mxu1 %vm3269_vm6, %v3268_v16  ;;  %v2367_v55 = vld [vmem:[%s4572_s13 + $0x18] sm:$0xff] }
 0x54b   : > { %3008 = vmatmul.mubr.msk.f32.vlgmr.msra.gmra.mxu0 %vm1657_vm9, %v1912_v57  ;;  %3041 = vmatprep.subr.mxu0 %v3268_v16  ;;  %v2365_v57 = vld [vmem:[%s4572_s13 + $0x8] sm:$0xff] }
 0x54c   : > { %3101 = vmatmul.mubr.msk.f32.vlgmr.msra.gmra.mxu1 %vm1657_vm9, %v2182_v58  ;;  %3042 = vmatpush3.msra.mxu0 %v2702_v56  ;;  %v2366_v56 = vld [vmem:[%s4572_s13 + $0x10] sm:$0xff]  ;;  %v2364_v58 = vld [vmem:[%s4572_s13] sm:$0xff] }
 0x54d   : > { %3043 = vmatprep.subr.mxu0 %v3268_v16  ;;  %3069 = vmatprep.mubr.msk.f32.mxu0 %vm3269_vm6, %v3268_v16 }
 0x54e   : > { %3044 = vmatpush3.msra.mxu0 %v2701_v59  ;;  %3136 = vmatprep.subr.mxu1 %v3268_v16  ;;  %v2288_v59 = vld [vmem:[%s4571_s12] sm:$0x1] }
 0x54f   : > { %3045 = vmatprep.subr.mxu0 %v3268_v16  ;;  %3158 = vmatprep.mubr.msk.f32.mxu1 %vm3269_vm6, %v3268_v16 }
 0x550   : > { %3046 = vmatpush3.msra.mxu0 %v2700_v60  ;;  %3137 = vmatpush3.msk.msra.mxu1 %vm1017_vm4, %v2374_v25 }
 0x551   : > { %3047 = vmatprep.subr.mxu0 %v3268_v16  ;;  %3138 = vmatprep.subr.mxu1 %v3268_v16 }
 0x552   : > { %3048 = vmatpush3.msra.mxu0 %v2699_v61  ;;  %3139 = vmatpush3.msra.mxu1 %v2373_v26 }
 0x553   : > { %3049 = vmatprep.subr.mxu0 %v3268_v16  ;;  %3140 = vmatprep.subr.mxu1 %v3268_v16 }
 0x554   : > { %3050 = vmatpush3.msra.mxu0 %v2698_v62  ;;  %3141 = vmatpush3.msra.mxu1 %v2372_v50 }
 0x555   : > { %3051 = vmatprep.subr.mxu0 %v3268_v16  ;;  %3142 = vmatprep.subr.mxu1 %v3268_v16 }
 0x556   : > { %3052 = vmatpush3.msra.mxu0 %v2697_v63  ;;  %3143 = vmatpush3.msra.mxu1 %v2371_v51 }
 0x557   : > { %3053 = vmatprep.subr.mxu0 %v3268_v16  ;;  %3144 = vmatprep.subr.mxu1 %v3268_v16 }
 0x558   : > { %3054 = vmatpush3.msra.mxu0 %v2696_v0  ;;  %3145 = vmatpush3.msra.mxu1 %v2370_v52  ;;  %v2375_v0 = vld [vmem:[%s4573_s14] sm:$0x1] }
 0x559   : > { %3055 = vmatprep.subr.mxu0 %v3268_v16  ;;  %3146 = vmatprep.subr.mxu1 %v3268_v16 }
 0x55a   : > { %3056 = vmatpush3.msra.mxu0 %v2695_v1  ;;  %3147 = vmatpush3.msra.mxu1 %v2369_v53 }
 0x55b   : > { %3057 = vmatprep.subr.mxu0 %v3268_v16  ;;  %3148 = vmatprep.subr.mxu1 %v3268_v16 }
 0x55c   : > { %3058 = vmatpush3.msra.mxu0 %v2694_v2  ;;  %3149 = vmatpush3.msra.mxu1 %v2368_v54 }
 0x55d   : > { %3059 = vmatprep.subr.mxu0 %v3268_v16  ;;  %3150 = vmatprep.subr.mxu1 %v3268_v16 }
 0x55e   : > { %3060 = vmatpush3.msra.mxu0 %v2693_v4  ;;  %3151 = vmatpush3.msra.mxu1 %v2367_v55 }
 0x55f   : > { %3061 = vmatprep.subr.mxu0 %v3268_v16  ;;  %3152 = vmatprep.subr.mxu1 %v3268_v16 }
 0x560   : > { %3062 = vmatpush3.msra.mxu0 %v2692_v5  ;;  %3153 = vmatpush3.msra.mxu1 %v2366_v56 }
 0x561   : > { %3063 = vmatprep.subr.mxu0 %v3268_v16  ;;  %3154 = vmatprep.subr.mxu1 %v3268_v16 }
 0x562   : > { %3064 = vmatpush3.msra.mxu0 %v2691_v6  ;;  %3155 = vmatpush3.msra.mxu1 %v2365_v57 }
 0x563   : > { %3065 = vmatprep.subr.mxu0 %v3268_v16  ;;  %3156 = vmatprep.subr.mxu1 %v3268_v16 }
 0x564   : > { %3066 = vmatpush3.msra.mxu0 %v2690_v8  ;;  %3157 = vmatpush3.msra.mxu1 %v2364_v58 }
 0x565   : > { %3067 = vmatprep.subr.mxu0 %v3268_v16 }
 0x566   : > { %3068 = vmatpush3.msra.mxu0 %v2689_v10 }
 0x567   : > { %3070 = vmatmul.mubr.msk.f32.vlgmr.msra.gmra.mxu0 %vm1657_vm9, %v2092_v11  ;;  %3103 = vmatprep.subr.mxu0 %v3268_v16 }
 0x568   : > { %3133 = vmatprep.mubr.msk.f32.mxu0 %vm3269_vm6, %v3268_v16  ;;  %3104 = vmatpush3.msra.mxu0 %v2287_v12 }
 0x569   : > { %3105 = vmatprep.subr.mxu0 %v3268_v16 }
 0x56a   : > { %3106 = vmatpush3.msra.mxu0 %v2286_v13 }
 0x56b   : > { %3107 = vmatprep.subr.mxu0 %v3268_v16 }
 0x56c   : > { %3108 = vmatpush3.msra.mxu0 %v2285_v14 }
 0x56d   : > { %3109 = vmatprep.subr.mxu0 %v3268_v16 }
 0x56e   : > { %3110 = vmatpush3.msra.mxu0 %v2284_v15 }
 0x56f   : > { %3111 = vmatprep.subr.mxu0 %v3268_v16 }
 0x570   : > { %3112 = vmatpush3.msra.mxu0 %v2283_v17 }
 0x571   : > { %3113 = vmatprep.subr.mxu0 %v3268_v16 }
 0x572   : > { %3114 = vmatpush3.msra.mxu0 %v2282_v18 }
 0x573   : > { %3115 = vmatprep.subr.mxu0 %v3268_v16 }
 0x574   : > { %3116 = vmatpush3.msra.mxu0 %v2281_v19 }
 0x575   : > { %3117 = vmatprep.subr.mxu0 %v3268_v16 }
 0x576   : > { %3118 = vmatpush3.msra.mxu0 %v2280_v20 }
 0x577   : > { %3119 = vmatprep.subr.mxu0 %v3268_v16 }
 0x578   : > { %3120 = vmatpush3.msra.mxu0 %v2279_v21 }
 0x579   : > { %3121 = vmatprep.subr.mxu0 %v3268_v16 }
 0x57a   : > { %3122 = vmatpush3.msra.mxu0 %v2278_v22 }
 0x57b   : > { %3123 = vmatprep.subr.mxu0 %v3268_v16 }
 0x57c   : > { %3124 = vmatpush3.msra.mxu0 %v2277_v23 }
 0x57d   : > { %3125 = vmatprep.subr.mxu0 %v3268_v16 }
 0x57e   : > { %3126 = vmatpush3.msra.mxu0 %v2276_v7 }
 0x57f   : > { %3127 = vmatprep.subr.mxu0 %v3268_v16 }
 0x580   : > { %3128 = vmatpush3.msra.mxu0 %v2275_v3 }
 0x581   : > { %3129 = vmatprep.subr.mxu0 %v3268_v16 }
 0x582   : > { %3130 = vmatpush3.msra.mxu0 %v2274_v9 }
 0x583   : > { %3131 = vmatprep.subr.mxu0 %v3268_v16 }
 0x584   : > { %3132 = vmatpush3.msra.mxu0 %v2273_v24 }
 0x5d0   : > { %v1727_v27 = vpop.f32.mrf.mxu0  ;;  %v1907_v28 = vpop.f32.mrf.mxu1 }
 0x5d1   : > { %v1731_v32 = vadd.f32 %v1727_v27, %v1641_v31 }
 0x5d2   : > { %v2916_v29 = vpop.f32.mrf.mxu0  ;;  %v2978_v30 = vpop.f32.mrf.mxu1 }
 0x5ed   : > { %v1817_v33 = vpop.f32.mrf.mxu0 }
 0x5ee   : > { %v1821_v34 = vadd.f32 %v1817_v33, %v1731_v32  ;;  %v2087_v35 = vpop.f32.mrf.mxu1 }
 0x5ef   : > { %v2947_v36 = vpop.f32.mrf.mxu0 }
 0x5f0   : > { %v3040_v37 = vpop.f32.mrf.mxu1  ;;  %v1911_v38 = vadd.f32 %v1907_v28, %v1821_v34 }
 0x60b   : > { %v1997_v39 = vpop.f32.mrf.mxu0 }
 0x60c   : > { %v2267_v40 = vpop.f32.mrf.mxu1  ;;  %v2001_v43 = vadd.f32 %v1997_v39, %v1911_v38 }
 0x60d   : > { %v3009_v41 = vpop.f32.mrf.mxu0 }
 0x60e   : > { %v3102_v42 = vpop.f32.mrf.mxu1  ;;  %v2091_v44 = vadd.f32 %v2087_v35, %v2001_v43 }
 0x627   : > { %v2177_v45 = vpop.f32.mrf.mxu0 }
 0x628   : > { %v2181_v46 = vadd.f32 %v2177_v45, %v2091_v44 }
 0x629   : > { %v3071_v47 = vpop.f32.mrf.mxu0 }
 0x62a   : > { %v2271_v48 = vadd.f32 %v2267_v40, %v2181_v46 }
 0x62c   : > { %3202 = vtanh.f32 %v2271_v48 }
 0x639   : > { %v3203_v49 = vpop.eup %3202 }
 0x63a   : > { %3134 = vmatmul.mubr.msk.f32.vlgmr.msra.gmra.mxu0 %vm2289_vm10, %v3203_v49 }
 0x6fa   : > { %v2359_v60 = vpop.f32.mrf.mxu0 }
 0x6fb   : > { %v2360_v61 = vadd.f32 %v2359_v60, %v2288_v59 }
 0x6fc   : > { %v3135_v62 = vpop.f32.mrf.mxu0 }
 0x6fd   : > { %3204 = vtanh.f32 %v2360_v61 }
 0x70a   : > { %v3205_v63 = vpop.eup %3204 }
 0x70b   : > { %3159 = vmatmul.mubr.msk.f32.vlgmr.msra.gmra.mxu1 %vm2376_vm11, %v3205_v63 }
 0x7cb   : > { %v2449_v16 = vpop.f32.mrf.mxu1 }
 0x7cc   : > { %v2450_v1 = vadd.f32 %v2449_v16, %v2375_v0 }
 0x7cd   : > { %v3160_v2 = vpop.f32.mrf.mxu1 }
 0x7ce   : > { %2454 = vst.msk [vmem:[%s486_s25] sm:$0x1] %vm2453_vm12, %v2450_v1 }
 0x7cf   : > { %3219 = shalt.err (!%p3216_p3)
}
 0x7d0   : > { %s3220_s23 = scalar_lea.hbm %s4524_s27, 16  ;;  %s3224_s26 = scalar_lea.hbm %s4574_s15, 32 }
 0x7d1   : > { %p3221_p4 = scmp.ne.s32.totalorder %s4524_s27, %s3220_s23  ;;  %p3225_p9 = scmp.lt.s32.totalorder %s4524_s27, %s4574_s15 }
 0x7d2   : > { %p3226_p10 = scmp.lt.s32.totalorder %s3224_s26, %s3220_s23 }
 0x7d3   : > { %p3222_p7 = pnand %p3221_p4, %p3389_p5 }
 0x7d4   : > { %p3227_p11 = por %p3226_p10, %p3225_p9 }
 0x7d5   : > { %p3223_p8 = pneg %p3222_p7 }
 0x7d7   : > { %p3228_p12 = pnand %p3227_p11, %p3223_p8 }
 0x7d9   : > { %3231 = shalt.err (!%p3228_p12)
}
 0x7da   : > { %3161 = dma.vmem_to_hbm [thread:$0]  (%p3389_p5), %s2469_s20, 16, %s4524_s27, %s2456_s29  }
 0x7db PF: > { %p3167_p13 = scmp.ge.s32.totalorder %s3266_s21, 2  ;;  %s2480_s16 = sand.u32 1, %s3254_s18  }
 0x7dc   : > { %s2481_s17 = scalar_lea.sflag [#allocation5], %s2480_s16 }
 0x7dd   : > { %p3164_p0 = pnand %p3167_p13, %p3393_p6 }
 0x7df   : > { %p3165_p1 = pneg %p3164_p0 }
 0x7e1   : > { %3249 = dma.done.wait (%p3165_p1), %s2481_s17, 16  }
 0x7e2   : > { %3251 = vsyncadd (%p3165_p1), %s2481_s17, 4294967280  ;;  %s4588_s21 = sld [smem:[#allocation8_spill]]  ;;  %s4591_s18 = smov %s3258_s19 }
 0x7e3   : > { %s4589_s23 = sld [smem:[#allocation7_spill]] }
 0x7e4   : > { %s4590_s20 = sld [smem:[#allocation9_spill]] }
 0x7e8   : > { %p25_p2 = scmp.ge.s32.totalorder %s4588_s21, 4  }
 0x7e9   : > { %s4592_s19 = smov %s4589_s23 }
 0x7ea   :  { %27 = sbr.rel (!%p25_p2) target bundleno = 5 (0x5), region = 125 }
 0x7ef   :  { %2485 = vsyncpa [#allocation5], 1 }
 0x7f0   :  { %2487 = vsyncpa [#allocation5 + $0x1], 1 }

</bundles_post_ra>
